<compile_context>
chip_gen: v7x
topology: tpu7x:2x2x1
jax: 0.10.0
libtpu: 0.0.40
codegen_flags: <defaults>
</compile_context>

<pallas_src>
import functools

import jax
import jax.numpy as jnp
from jax.experimental import pallas as pl
from jax.experimental.pallas import tpu as pltpu


_VMEM_LIMIT = 48 * 1024 * 1024   # leave headroom under v7x's 64 MiB physical VMEM


# ----------------------------- tiling helpers ------------------------------

def _row_tile(rows, cap=256):
    """Tile along a sublane (second-to-last) block dim: multiple of 8 or full."""
    if rows <= cap:
        return rows                       # full extent is always a legal block
    for t in (512, 256, 128, 64, 32, 16, 8):
        if t <= cap and rows % t == 0:
            return t
    # TODO(synk): pad ragged row counts to a multiple of 8 instead of falling
    # back to a single full (un-pipelined) block.
    return rows


def _lane_tile(cols, cap=512):
    """Tile along the lane (last) block dim: multiple of 128 or full."""
    if cols <= cap:
        return cols
    for t in (512, 256, 128):
        if t <= cap and cols % t == 0:
            return t
    return cols


# ----------------------------- Pallas kernels ------------------------------

def _proj_kernel(x_ref, wcat_ref, q_ref, k_ref, v_ref, w_ref, acc_ref,
                 *, num_heads, cin, cout):
    # One wide matmul per (row tile, cin tile):  x [tm, tk] @ Wcat [tk, Ctot].
    # Ctot = 2*cin + 2*cout, columns ordered [q | k | v | w].
    kk = pl.program_id(1)

    @pl.when(kk == 0)
    def _():
        acc_ref[...] = jnp.zeros(acc_ref.shape, jnp.float32)

    acc_ref[...] += jnp.dot(x_ref[...].astype(jnp.bfloat16), wcat_ref[...],
                            preferred_element_type=jnp.float32)

    @pl.when(kk == pl.num_programs(1) - 1)
    def _():
        acc = acc_ref[...]
        hd = cin // num_heads
        vd = cout // num_heads
        for hi in range(num_heads):                      # static unroll (small h)
            q_ref[hi] = acc[:, hi * hd:(hi + 1) * hd].astype(jnp.bfloat16)
            k_ref[hi] = acc[:, cin + hi * hd:cin + (hi + 1) * hd].astype(jnp.bfloat16)
            v_ref[hi] = acc[:, 2 * cin + hi * vd:2 * cin + (hi + 1) * vd].astype(jnp.bfloat16)
        w_ref[...] = acc[:, 2 * cin + cout:]             # gate logits stay f32


def _flash_attn_kernel(q_ref, k_ref, v_ref, o_ref, m_ref, l_ref, acc_ref,
                       *, scale, num_heads, vd):
    # Online-softmax attention over a kv-tiled grid axis; all heads per step.
    # q [h, tq, hd], k [h, tkv, hd], v [h, tkv, vd] (bf16); output [tq, h*vd].
    ki = pl.program_id(2)

    @pl.when(ki == 0)
    def _():
        m_ref[...] = jnp.full(m_ref.shape, -jnp.inf, jnp.float32)
        l_ref[...] = jnp.zeros(l_ref.shape, jnp.float32)
        acc_ref[...] = jnp.zeros(acc_ref.shape, jnp.float32)

    q = q_ref[...]
    k = k_ref[...]
    v = v_ref[...]
    s = jnp.einsum('hqd,hkd->hqk', q, k,
                   preferred_element_type=jnp.float32) * scale
    m_prev = m_ref[...]
    m_new = jnp.maximum(m_prev, jnp.max(s, axis=-1, keepdims=True))
    alpha = jnp.exp(m_prev - m_new)
    p = jnp.exp(s - m_new)
    l_ref[...] = alpha * l_ref[...] + jnp.sum(p, axis=-1, keepdims=True)
    acc_ref[...] = alpha * acc_ref[...] + jnp.einsum(
        'hqk,hkd->hqd', p.astype(jnp.bfloat16), v,
        preferred_element_type=jnp.float32)
    m_ref[...] = m_new

    @pl.when(ki == pl.num_programs(2) - 1)
    def _():
        # EUP reciprocal; ~1e-3 rel. error is below bf16 output resolution.
        inv = pl.reciprocal(l_ref[...], approx=True)
        heads = [(acc_ref[hi] * inv[hi]).astype(o_ref.dtype)
                 for hi in range(num_heads)]
        o_ref[...] = jnp.concatenate(heads, axis=-1)     # lane-dense single store


def _mem_attn_kernel(q_ref, kmem_ref, vmem_ref, o_ref,
                     bs_ref, bk_ref, bv_ref,
                     *, scale, num_heads, vd, has_pad):
    # Fused per-head FIFO-memory inner-product search (items_per_query == 1)
    # + second attention.  Memory (b*n) axis streamed as grid axis 1; running
    # best score / key / value carried in VMEM scratch.
    # q [h, n, hd]; kmem [h, tmem, hd]; vmem [h, tmem, vd]  (all bf16).
    mi = pl.program_id(1)

    @pl.when(mi == 0)
    def _():
        bs_ref[...] = jnp.full(bs_ref.shape, -jnp.inf, jnp.float32)
        bk_ref[...] = jnp.zeros(bk_ref.shape, jnp.float32)
        bv_ref[...] = jnp.zeros(bv_ref.shape, jnp.float32)

    q = q_ref[...]
    km = kmem_ref[...]
    vm = vmem_ref[...]
    # Raw inner-product scores (faiss IndexFlatIP searches with unscaled q).
    s = jnp.einsum('hqd,hkd->hqk', q, km,
                   preferred_element_type=jnp.float32)          # [h, n, tmem]
    msz = s.shape[-1]
    col = jax.lax.broadcasted_iota(jnp.int32, s.shape, 2)
    tile_max = jnp.max(s, axis=-1, keepdims=True)               # [h, n, 1]
    first = jnp.min(jnp.where(s >= tile_max, col, msz),
                    axis=-1, keepdims=True)                     # first occurrence
    onehot = (col == first).astype(jnp.bfloat16)                # exact 0/1 select
    cand_k = jnp.einsum('hqk,hkd->hqd', onehot, km,
                        preferred_element_type=jnp.float32)
    cand_v = jnp.einsum('hqk,hkd->hqd', onehot, vm,
                        preferred_element_type=jnp.float32)
    upd = tile_max > bs_ref[...]        # strict >  ⇒ earliest tile wins ties
    bk_ref[...] = jnp.where(upd, cand_k, bk_ref[...])
    bv_ref[...] = jnp.where(upd, cand_v, bv_ref[...])
    bs_ref[...] = jnp.maximum(bs_ref[...], tile_max)

    @pl.when(mi == pl.num_programs(1) - 1)
    def _():
        ks = bk_ref[...]
        vs = bv_ref[...]
        if has_pad:
            # FIFO zero rows sit at indices BELOW every inserted item, so the
            # pad row wins the first-occurrence argmax iff max(real) <= 0.
            hit = bs_ref[...] > 0.0
            ks = jnp.where(hit, ks, 0.0)
            vs = jnp.where(hit, vs, 0.0)
        # Second attention: q attends over the batch's n selected memory rows.
        s2 = jnp.einsum('hqd,hkd->hqk', q, ks.astype(jnp.bfloat16),
                        preferred_element_type=jnp.float32) * scale
        s2 = s2 - jnp.max(s2, axis=-1, keepdims=True)
        p2 = jnp.exp(s2)
        p2 = p2 * pl.reciprocal(jnp.sum(p2, axis=-1, keepdims=True), approx=True)
        o = jnp.einsum('hqk,hkd->hqd', p2.astype(jnp.bfloat16),
                       vs.astype(jnp.bfloat16),
                       preferred_element_type=jnp.float32)
        heads = [o[hi].astype(o_ref.dtype) for hi in range(num_heads)]
        o_ref[...] = jnp.concatenate(heads, axis=-1)


def _out_gate_kernel(a_ref, am_ref, w_ref, wo_ref, bo_ref, o_ref,
                     ya_ref, yam_ref):
    # Fused to_out(a), to_out(a_m), bias and sigmoid gate; contraction dim
    # h*vd tiled as grid axis 1 with f32 accumulators.
    kk = pl.program_id(1)

    @pl.when(kk == 0)
    def _():
        ya_ref[...] = jnp.zeros(ya_ref.shape, jnp.float32)
        yam_ref[...] = jnp.zeros(yam_ref.shape, jnp.float32)

    wo = wo_ref[...]                                     # [tkc, cout] bf16
    ya_ref[...] += jnp.dot(a_ref[...], wo, preferred_element_type=jnp.float32)
    yam_ref[...] += jnp.dot(am_ref[...], wo, preferred_element_type=jnp.float32)

    @pl.when(kk == pl.num_programs(1) - 1)
    def _():
        g = jax.nn.sigmoid(w_ref[...])
        # g*(ya+bo) + (1-g)*(yam+bo) == (yam+bo) + g*(ya-yam)
        o_ref[...] = (yam_ref[...] + bo_ref[...]) + g * (ya_ref[...] - yam_ref[...])


# ----------------------------- wrappers -------------------------------------

def project_qkvw(x_flat, wcat, *, num_heads, cin, cout):
    bn = x_flat.shape[0]
    h = num_heads
    hd = cin // h
    vd = cout // h
    ctot = wcat.shape[1]
    tm = _row_tile(bn, 256)
    tk = _lane_tile(cin, 512)
    # TODO(synk): for very wide models also tile ctot (output channels).
    return pl.pallas_call(
        functools.partial(_proj_kernel, num_heads=h, cin=cin, cout=cout),
        out_shape=(jax.ShapeDtypeStruct((h, bn, hd), jnp.bfloat16),
                   jax.ShapeDtypeStruct((h, bn, hd), jnp.bfloat16),
                   jax.ShapeDtypeStruct((h, bn, vd), jnp.bfloat16),
                   jax.ShapeDtypeStruct((bn, cout), jnp.float32)),
        grid=(bn // tm, cin // tk),
        in_specs=[
            pl.BlockSpec((tm, tk), lambda i, kk: (i, kk)),
            pl.BlockSpec((tk, ctot), lambda i, kk: (kk, 0)),
        ],
        out_specs=(
            pl.BlockSpec((h, tm, hd), lambda i, kk: (0, i, 0)),
            pl.BlockSpec((h, tm, hd), lambda i, kk: (0, i, 0)),
            pl.BlockSpec((h, tm, vd), lambda i, kk: (0, i, 0)),
            pl.BlockSpec((tm, cout), lambda i, kk: (i, 0)),
        ),
        scratch_shapes=[pltpu.VMEM((tm, ctot), jnp.float32)],
        compiler_params=pltpu.CompilerParams(
            dimension_semantics=("parallel", "arbitrary"),
            vmem_limit_bytes=_VMEM_LIMIT),
    )(x_flat, wcat)


def attention_rowmajor(q_h, k_h, v_h, batch, *, scale):
    """Flash-style MHA; inputs head-major bf16, output row-major [b*n, h*vd]."""
    h, bn, hd = q_h.shape
    vd = v_h.shape[-1]
    cout = h * vd
    n = bn // batch
    m = k_h.shape[1] // batch
    tq = _row_tile(n, 256)
    tkv = _row_tile(m, 512)
    n_qt = n // tq
    n_kvt = m // tkv
    return pl.pallas_call(
        functools.partial(_flash_attn_kernel, scale=scale, num_heads=h, vd=vd),
        out_shape=jax.ShapeDtypeStruct((bn, cout), jnp.bfloat16),
        grid=(batch, n_qt, n_kvt),
        in_specs=[
            pl.BlockSpec((h, tq, hd), lambda bi, qi, ki: (0, bi * n_qt + qi, 0)),
            pl.BlockSpec((h, tkv, hd), lambda bi, qi, ki: (0, bi * n_kvt + ki, 0)),
            pl.BlockSpec((h, tkv, vd), lambda bi, qi, ki: (0, bi * n_kvt + ki, 0)),
        ],
        out_specs=pl.BlockSpec((tq, cout), lambda bi, qi, ki: (bi * n_qt + qi, 0)),
        scratch_shapes=[pltpu.VMEM((h, tq, 1), jnp.float32),
                        pltpu.VMEM((h, tq, 1), jnp.float32),
                        pltpu.VMEM((h, tq, vd), jnp.float32)],
        compiler_params=pltpu.CompilerParams(
            dimension_semantics=("parallel", "parallel", "arbitrary"),
            vmem_limit_bytes=_VMEM_LIMIT),
    )(q_h, k_h, v_h)


def memory_attention(q_h, k_h, v_h, batch, *, scale, has_pad):
    """Fused per-head KVMemory lookup + second attention; memory axis streamed."""
    h, bn, hd = q_h.shape
    vd = v_h.shape[-1]
    cout = h * vd
    n = bn // batch
    tmem = _row_tile(bn, 512)
    n_mt = bn // tmem
    return pl.pallas_call(
        functools.partial(_mem_attn_kernel, scale=scale, num_heads=h, vd=vd,
                          has_pad=has_pad),
        out_shape=jax.ShapeDtypeStruct((bn, cout), jnp.bfloat16),
        grid=(batch, n_mt),
        in_specs=[
            pl.BlockSpec((h, n, hd), lambda bi, mi: (0, bi, 0)),
            pl.BlockSpec((h, tmem, hd), lambda bi, mi: (0, mi, 0)),
            pl.BlockSpec((h, tmem, vd), lambda bi, mi: (0, mi, 0)),
        ],
        out_specs=pl.BlockSpec((n, cout), lambda bi, mi: (bi, 0)),
        scratch_shapes=[pltpu.VMEM((h, n, 1), jnp.float32),
                        pltpu.VMEM((h, n, hd), jnp.float32),
                        pltpu.VMEM((h, n, vd), jnp.float32)],
        compiler_params=pltpu.CompilerParams(
            dimension_semantics=("parallel", "arbitrary"),
            vmem_limit_bytes=_VMEM_LIMIT),
    )(q_h, k_h, v_h)


def out_and_gate(a_rm, am_rm, w_lin, wo_t, bo):
    bn, cout = w_lin.shape
    tm = _row_tile(bn, 256)
    tkc = _lane_tile(cout, 512)
    return pl.pallas_call(
        _out_gate_kernel,
        out_shape=jax.ShapeDtypeStruct((bn, cout), jnp.float32),
        grid=(bn // tm, cout // tkc),
        in_specs=[
            pl.BlockSpec((tm, tkc), lambda i, kk: (i, kk)),
            pl.BlockSpec((tm, tkc), lambda i, kk: (i, kk)),
            pl.BlockSpec((tm, cout), lambda i, kk: (i, 0)),
            pl.BlockSpec((tkc, cout), lambda i, kk: (kk, 0)),
            pl.BlockSpec((1, cout), lambda i, kk: (0, 0)),
        ],
        out_specs=pl.BlockSpec((tm, cout), lambda i, kk: (i, 0)),
        scratch_shapes=[pltpu.VMEM((tm, cout), jnp.float32),
                        pltpu.VMEM((tm, cout), jnp.float32)],
        compiler_params=pltpu.CompilerParams(
            dimension_semantics=("parallel", "arbitrary"),
            vmem_limit_bytes=_VMEM_LIMIT),
    )(a_rm, am_rm, w_lin, wo_t, bo)


# ----------------------------- forward / params -----------------------------

def prepare_params(params):
    """One-time weight layout prep (call OUTSIDE jit and reuse across steps)."""
    cout = params["wv"].shape[0]
    wcat = jnp.concatenate(
        [params["wq"].T, params["wk"].T, params["wv"].T, params["ww"].T],
        axis=1).astype(jnp.bfloat16)                       # [cin, 2cin+2cout]
    wo_t = params["wo"].T.astype(jnp.bfloat16)             # [cout, cout]
    bo = params["bo"].reshape(1, cout).astype(jnp.float32)
    return {"wcat": wcat, "wo_t": wo_t, "bo": bo}


def mablock_forward(x, prep, *, num_heads, memory_size, items_per_query=1):
    """MABlock.forward — memory at its freshly-initialized (all-zeros) state."""
    assert items_per_query == 1, "only items_per_query=1 (module default) supported"
    # TODO(synk): items_per_query > 1 would need an in-kernel top-k instead of argmax.
    b, n, cin = x.shape
    cout = prep["wo_t"].shape[0]
    assert prep["wcat"].shape[0] == cin
    h = num_heads
    hd = cin // h
    scale = float(hd) ** -0.5
    bn = b * n
    pad = memory_size - bn
    assert pad >= 0, "more items inserted than memory size"
    assert b == 1 or n % 8 == 0, "sequence length must be a multiple of 8"

    x_flat = x.reshape(bn, cin)

    # Fused projections: q/k/v head-major bf16 [h, b*n, d], gate logits w f32.
    q_h, k_h, v_h, w_lin = project_qkvw(x_flat, prep["wcat"],
                                        num_heads=h, cin=cin, cout=cout)

    # a = attention(q, k, v)   — row-major [b*n, h*vd] bf16.
    a_rm = attention_rowmajor(q_h, k_h, v_h, b, scale=scale)

    # a_m = attention(q, k_m, v_m) with per-head FIFO-memory lookup fused in.
    am_rm = memory_attention(q_h, k_h, v_h, b, scale=scale, has_pad=pad > 0)

    # Fused to_out (both branches) + bias + sigmoid gate.
    out = out_and_gate(a_rm, am_rm, w_lin, prep["wo_t"], prep["bo"])
    return out.reshape(b, n, cout)


def init_params(key, in_features, out_features):
    ks = jax.random.split(key, 6)
    s_in = 1.0 / jnp.sqrt(jnp.float32(in_features))
    s_out = 1.0 / jnp.sqrt(jnp.float32(out_features))
    return {
        "wq": jax.random.normal(ks[0], (in_features, in_features), jnp.float32) * s_in,
        "wk": jax.random.normal(ks[1], (in_features, in_features), jnp.float32) * s_in,
        "wv": jax.random.normal(ks[2], (out_features, in_features), jnp.float32) * s_in,
        "ww": jax.random.normal(ks[3], (out_features, in_features), jnp.float32) * s_in,
        "wo": jax.random.normal(ks[4], (out_features, out_features), jnp.float32) * s_out,
        "bo": jax.random.normal(ks[5], (out_features,), jnp.float32) * s_out,
    }


# ----------------------------- demo ------------------------------------------

if __name__ == "__main__":
    B, N = 2, 8
    IN_FEATURES, OUT_FEATURES = 32, 32
    NUM_HEADS = 2
    MEMORY_SIZE = 32          # >= B * N inserted items (so FIFO zero pad exists)
    ITEMS_PER_QUERY = 1

    key = jax.random.PRNGKey(0)
    kx, kp = jax.random.split(key)
    x = jax.random.normal(kx, (B, N, IN_FEATURES), jnp.float32)
    params = init_params(kp, IN_FEATURES, OUT_FEATURES)
    prep = prepare_params(params)      # one-time weight prep, outside jit

    fwd = jax.jit(functools.partial(mablock_forward,
                                    num_heads=NUM_HEADS,
                                    memory_size=MEMORY_SIZE,
                                    items_per_query=ITEMS_PER_QUERY))
    out = jax.block_until_ready(fwd(x, prep))
    assert out.shape == (B, N, OUT_FEATURES)
    print("KERNEL_OK")
</pallas_src>

<mosaic_0001>
module attributes {stable_mosaic.version = 11 : i64} {
  func.func @_mem_attn_kernel(%arg0: i32, %arg1: i32, %arg2: memref<2x8x16xbf16, #tpu.memory_space<vmem>>, %arg3: memref<2x16x16xbf16, #tpu.memory_space<vmem>>, %arg4: memref<2x16x16xbf16, #tpu.memory_space<vmem>>, %arg5: memref<8x32xbf16, #tpu.memory_space<vmem>>, %arg6: memref<2x8x1xf32, #tpu.memory_space<vmem>>, %arg7: memref<2x8x16xf32, #tpu.memory_space<vmem>>, %arg8: memref<2x8x16xf32, #tpu.memory_space<vmem>>) attributes {dimension_semantics = [#tpu.dimension_semantics<parallel>, #tpu.dimension_semantics<arbitrary>], iteration_bounds = array<i64: 2, 1>, scalar_prefetch = 0 : i64, scratch_operands = 3 : i64, tpu.core_type = #tpu.core_type<tc>, window_params = [{transform_indices = @transform_0, window_bounds = array<i64: 2, 8, 16>}, {transform_indices = @transform_1, window_bounds = array<i64: 2, 16, 16>}, {transform_indices = @transform_2, window_bounds = array<i64: 2, 16, 16>}, {transform_indices = @transform_3, window_bounds = array<i64: 8, 32>}]} {
    %c0_i32 = arith.constant 0 : i32
    %0 = arith.cmpi eq, %arg1, %c0_i32 : i32
    %1 = arith.extui %0 : i1 to i32
    %c0_i32_0 = arith.constant 0 : i32
    %2 = arith.cmpi ne, %1, %c0_i32_0 : i32
    scf.if %2 {
      %cst_36 = arith.constant 0xFF800000 : f32
      %41 = vector.broadcast %cst_36 : f32 to vector<2x8x1xf32>
      %c0_37 = arith.constant 0 : index
      %c0_38 = arith.constant 0 : index
      %c0_39 = arith.constant 0 : index
      %42 = vector.load %arg6[%c0_37, %c0_38, %c0_39] : memref<2x8x1xf32, #tpu.memory_space<vmem>>, vector<2x8x1xf32>
      tpu.vector_store %arg6[%c0_37, %c0_38, %c0_39], %41 {strides = array<i32>} : memref<2x8x1xf32, #tpu.memory_space<vmem>>, vector<2x8x1xf32>,
      %cst_40 = arith.constant 0.000000e+00 : f32
      %43 = vector.broadcast %cst_40 : f32 to vector<2x8x16xf32>
      %c0_41 = arith.constant 0 : index
      %c0_42 = arith.constant 0 : index
      %c0_43 = arith.constant 0 : index
      %44 = vector.load %arg7[%c0_41, %c0_42, %c0_43] : memref<2x8x16xf32, #tpu.memory_space<vmem>>, vector<2x8x16xf32>
      tpu.vector_store %arg7[%c0_41, %c0_42, %c0_43], %43 {strides = array<i32>} : memref<2x8x16xf32, #tpu.memory_space<vmem>>, vector<2x8x16xf32>,
      %cst_44 = arith.constant 0.000000e+00 : f32
      %45 = vector.broadcast %cst_44 : f32 to vector<2x8x16xf32>
      %c0_45 = arith.constant 0 : index
      %c0_46 = arith.constant 0 : index
      %c0_47 = arith.constant 0 : index
      %46 = vector.load %arg8[%c0_45, %c0_46, %c0_47] : memref<2x8x16xf32, #tpu.memory_space<vmem>>, vector<2x8x16xf32>
      tpu.vector_store %arg8[%c0_45, %c0_46, %c0_47], %45 {strides = array<i32>} : memref<2x8x16xf32, #tpu.memory_space<vmem>>, vector<2x8x16xf32>,
    } else {
    }
    %c0 = arith.constant 0 : index
    %c0_1 = arith.constant 0 : index
    %c0_2 = arith.constant 0 : index
    %3 = vector.load %arg2[%c0, %c0_1, %c0_2] : memref<2x8x16xbf16, #tpu.memory_space<vmem>>, vector<2x8x16xbf16>
    %c0_3 = arith.constant 0 : index
    %c0_4 = arith.constant 0 : index
    %c0_5 = arith.constant 0 : index
    %4 = vector.load %arg3[%c0_3, %c0_4, %c0_5] : memref<2x16x16xbf16, #tpu.memory_space<vmem>>, vector<2x16x16xbf16>
    %c0_6 = arith.constant 0 : index
    %c0_7 = arith.constant 0 : index
    %c0_8 = arith.constant 0 : index
    %5 = vector.load %arg4[%c0_6, %c0_7, %c0_8] : memref<2x16x16xbf16, #tpu.memory_space<vmem>>, vector<2x16x16xbf16>
    "tpu.trace_start"() <{level = 10 : i32, message = "hqd,hkd->hqk"}> : () -> ()
    %cst = arith.constant dense<0.000000e+00> : vector<2x8x16xf32>
    %6 = tpu.matmul %3, %4, %cst {dimension_numbers = #tpu.dot_dimension_numbers<[2], [2], [1], [1], [0, 0, 0, 1, 1, 1], [0], [0]>} : vector<2x8x16xbf16>, vector<2x16x16xbf16>, vector<2x8x16xf32> -> vector<2x8x16xf32>
    "tpu.trace_stop"() : () -> ()
    %7 = tpu.iota {dimensions = array<i32: 2>} : vector<2x8x16xi32>
    %cst_9 = arith.constant dense<0xFF800000> : vector<2x8xf32>
    %8 = vector.multi_reduction <maximumf>, %6, %cst_9 [2] : vector<2x8x16xf32> to vector<2x8xf32>
    %9 = vector.shape_cast %8 : vector<2x8xf32> to vector<2x8x1xf32>
    %10 = vector.broadcast %9 : vector<2x8x1xf32> to vector<2x8x16xf32>
    %11 = arith.cmpf oge, %6, %10 : vector<2x8x16xf32>
    %c16_i32 = arith.constant 16 : i32
    %12 = vector.broadcast %c16_i32 : i32 to vector<2x8x16xi32>
    %13 = arith.select %11, %7, %12 : vector<2x8x16xi1>, vector<2x8x16xi32>
    %cst_10 = arith.constant dense<2147483647> : vector<2x8xi32>
    %14 = vector.multi_reduction <minsi>, %13, %cst_10 [2] : vector<2x8x16xi32> to vector<2x8xi32>
    %15 = vector.shape_cast %14 : vector<2x8xi32> to vector<2x8x1xi32>
    %16 = vector.broadcast %15 : vector<2x8x1xi32> to vector<2x8x16xi32>
    %17 = arith.cmpi eq, %7, %16 : vector<2x8x16xi32>
    %18 = arith.extui %17 : vector<2x8x16xi1> to vector<2x8x16xi32>
    %19 = arith.sitofp %18 : vector<2x8x16xi32> to vector<2x8x16xf32>
    %20 = arith.truncf %19 : vector<2x8x16xf32> to vector<2x8x16xbf16>
    "tpu.trace_start"() <{level = 10 : i32, message = "hqk,hkd->hqd"}> : () -> ()
    %cst_11 = arith.constant dense<0.000000e+00> : vector<2x8x16xf32>
    %21 = tpu.matmul %20, %4, %cst_11 {dimension_numbers = #tpu.dot_dimension_numbers<[2], [1], [1], [2], [0, 0, 0, 1, 1, 2], [0], [0]>} : vector<2x8x16xbf16>, vector<2x16x16xbf16>, vector<2x8x16xf32> -> vector<2x8x16xf32>
    %cst_12 = arith.constant dense<0.000000e+00> : vector<2x8x16xf32>
    %22 = tpu.matmul %20, %5, %cst_12 {dimension_numbers = #tpu.dot_dimension_numbers<[2], [1], [1], [2], [0, 0, 0, 1, 1, 2], [0], [0]>} : vector<2x8x16xbf16>, vector<2x16x16xbf16>, vector<2x8x16xf32> -> vector<2x8x16xf32>
    "tpu.trace_stop"() : () -> ()
    %c0_13 = arith.constant 0 : index
    %c0_14 = arith.constant 0 : index
    %c0_15 = arith.constant 0 : index
    %23 = vector.load %arg6[%c0_13, %c0_14, %c0_15] : memref<2x8x1xf32, #tpu.memory_space<vmem>>, vector<2x8x1xf32>
    %24 = arith.cmpf ogt, %9, %23 : vector<2x8x1xf32>
    %c0_16 = arith.constant 0 : index
    %c0_17 = arith.constant 0 : index
    %c0_18 = arith.constant 0 : index
    %25 = vector.load %arg7[%c0_16, %c0_17, %c0_18] : memref<2x8x16xf32, #tpu.memory_space<vmem>>, vector<2x8x16xf32>
    %26 = vector.shape_cast %24 : vector<2x8x1xi1> to vector<2x8x1xi1>
    %27 = vector.broadcast %26 : vector<2x8x1xi1> to vector<2x8x16xi1>
    %28 = arith.select %27, %21, %25 : vector<2x8x16xi1>, vector<2x8x16xf32>
    %c0_19 = arith.constant 0 : index
    %c0_20 = arith.constant 0 : index
    %c0_21 = arith.constant 0 : index
    %29 = vector.load %arg7[%c0_19, %c0_20, %c0_21] : memref<2x8x16xf32, #tpu.memory_space<vmem>>, vector<2x8x16xf32>
    tpu.vector_store %arg7[%c0_19, %c0_20, %c0_21], %28 {strides = array<i32>} : memref<2x8x16xf32, #tpu.memory_space<vmem>>, vector<2x8x16xf32>,
    %c0_22 = arith.constant 0 : index
    %c0_23 = arith.constant 0 : index
    %c0_24 = arith.constant 0 : index
    %30 = vector.load %arg8[%c0_22, %c0_23, %c0_24] : memref<2x8x16xf32, #tpu.memory_space<vmem>>, vector<2x8x16xf32>
    %31 = vector.shape_cast %24 : vector<2x8x1xi1> to vector<2x8x1xi1>
    %32 = vector.broadcast %31 : vector<2x8x1xi1> to vector<2x8x16xi1>
    %33 = arith.select %32, %22, %30 : vector<2x8x16xi1>, vector<2x8x16xf32>
    %c0_25 = arith.constant 0 : index
    %c0_26 = arith.constant 0 : index
    %c0_27 = arith.constant 0 : index
    %34 = vector.load %arg8[%c0_25, %c0_26, %c0_27] : memref<2x8x16xf32, #tpu.memory_space<vmem>>, vector<2x8x16xf32>
    tpu.vector_store %arg8[%c0_25, %c0_26, %c0_27], %33 {strides = array<i32>} : memref<2x8x16xf32, #tpu.memory_space<vmem>>, vector<2x8x16xf32>,
    %c0_28 = arith.constant 0 : index
    %c0_29 = arith.constant 0 : index
    %c0_30 = arith.constant 0 : index
    %35 = vector.load %arg6[%c0_28, %c0_29, %c0_30] : memref<2x8x1xf32, #tpu.memory_space<vmem>>, vector<2x8x1xf32>
    %36 = arith.maximumf %35, %9 : vector<2x8x1xf32>
    %c0_31 = arith.constant 0 : index
    %c0_32 = arith.constant 0 : index
    %c0_33 = arith.constant 0 : index
    %37 = vector.load %arg6[%c0_31, %c0_32, %c0_33] : memref<2x8x1xf32, #tpu.memory_space<vmem>>, vector<2x8x1xf32>
    tpu.vector_store %arg6[%c0_31, %c0_32, %c0_33], %36 {strides = array<i32>} : memref<2x8x1xf32, #tpu.memory_space<vmem>>, vector<2x8x1xf32>,
    %c0_i32_34 = arith.constant 0 : i32
    %38 = arith.cmpi eq, %arg1, %c0_i32_34 : i32
    %39 = arith.extui %38 : i1 to i32
    %c0_i32_35 = arith.constant 0 : i32
    %40 = arith.cmpi ne, %39, %c0_i32_35 : i32
    scf.if %40 {
      %c0_36 = arith.constant 0 : index
      %c0_37 = arith.constant 0 : index
      %c0_38 = arith.constant 0 : index
      %41 = vector.load %arg7[%c0_36, %c0_37, %c0_38] : memref<2x8x16xf32, #tpu.memory_space<vmem>>, vector<2x8x16xf32>
      %c0_39 = arith.constant 0 : index
      %c0_40 = arith.constant 0 : index
      %c0_41 = arith.constant 0 : index
      %42 = vector.load %arg8[%c0_39, %c0_40, %c0_41] : memref<2x8x16xf32, #tpu.memory_space<vmem>>, vector<2x8x16xf32>
      %c0_42 = arith.constant 0 : index
      %c0_43 = arith.constant 0 : index
      %c0_44 = arith.constant 0 : index
      %43 = vector.load %arg6[%c0_42, %c0_43, %c0_44] : memref<2x8x1xf32, #tpu.memory_space<vmem>>, vector<2x8x1xf32>
      %cst_45 = arith.constant 0.000000e+00 : f32
      %44 = vector.broadcast %cst_45 : f32 to vector<2x8x1xf32>
      %45 = arith.cmpf ogt, %43, %44 : vector<2x8x1xf32>
      %cst_46 = arith.constant 0.000000e+00 : f32
      %46 = vector.shape_cast %45 : vector<2x8x1xi1> to vector<2x8x1xi1>
      %47 = vector.broadcast %46 : vector<2x8x1xi1> to vector<2x8x16xi1>
      %48 = vector.broadcast %cst_46 : f32 to vector<2x8x16xf32>
      %49 = arith.select %47, %41, %48 : vector<2x8x16xi1>, vector<2x8x16xf32>
      %cst_47 = arith.constant 0.000000e+00 : f32
      %50 = vector.shape_cast %45 : vector<2x8x1xi1> to vector<2x8x1xi1>
      %51 = vector.broadcast %50 : vector<2x8x1xi1> to vector<2x8x16xi1>
      %52 = vector.broadcast %cst_47 : f32 to vector<2x8x16xf32>
      %53 = arith.select %51, %42, %52 : vector<2x8x16xi1>, vector<2x8x16xf32>
      %54 = arith.truncf %49 : vector<2x8x16xf32> to vector<2x8x16xbf16>
      "tpu.trace_start"() <{level = 10 : i32, message = "hqd,hkd->hqk"}> : () -> ()
      %cst_48 = arith.constant dense<0.000000e+00> : vector<2x8x8xf32>
      %55 = tpu.matmul %3, %54, %cst_48 {dimension_numbers = #tpu.dot_dimension_numbers<[2], [2], [1], [1], [0, 0, 0, 1, 1, 1], [0], [0]>} : vector<2x8x16xbf16>, vector<2x8x16xbf16>, vector<2x8x8xf32> -> vector<2x8x8xf32>
      "tpu.trace_stop"() : () -> ()
      %cst_49 = arith.constant 2.500000e-01 : f32
      %56 = vector.broadcast %cst_49 : f32 to vector<2x8x8xf32>
      %57 = arith.mulf %55, %56 : vector<2x8x8xf32>
      %cst_50 = arith.constant dense<0xFF800000> : vector<2x8xf32>
      %58 = vector.multi_reduction <maximumf>, %57, %cst_50 [2] : vector<2x8x8xf32> to vector<2x8xf32>
      %59 = vector.shape_cast %58 : vector<2x8xf32> to vector<2x8x1xf32>
      %60 = vector.broadcast %59 : vector<2x8x1xf32> to vector<2x8x8xf32>
      %61 = arith.subf %57, %60 : vector<2x8x8xf32>
      %62 = math.exp %61 : vector<2x8x8xf32>
      %cst_51 = arith.constant dense<0.000000e+00> : vector<2x8xf32>
      %63 = vector.multi_reduction <add>, %62, %cst_51 [2] : vector<2x8x8xf32> to vector<2x8xf32>
      %64 = vector.shape_cast %63 : vector<2x8xf32> to vector<2x8x1xf32>
      %65 = tpu.reciprocal %64 {approx = true} : vector<2x8x1xf32> -> vector<2x8x1xf32>
      %66 = vector.broadcast %65 : vector<2x8x1xf32> to vector<2x8x8xf32>
      %67 = arith.mulf %62, %66 : vector<2x8x8xf32>
      %68 = arith.truncf %67 : vector<2x8x8xf32> to vector<2x8x8xbf16>
      %69 = arith.truncf %53 : vector<2x8x16xf32> to vector<2x8x16xbf16>
      "tpu.trace_start"() <{level = 10 : i32, message = "hqk,hkd->hqd"}> : () -> ()
      %cst_52 = arith.constant dense<0.000000e+00> : vector<2x8x16xf32>
      %70 = tpu.matmul %68, %69, %cst_52 {dimension_numbers = #tpu.dot_dimension_numbers<[2], [1], [1], [2], [0, 0, 0, 1, 1, 2], [0], [0]>} : vector<2x8x8xbf16>, vector<2x8x16xbf16>, vector<2x8x16xf32> -> vector<2x8x16xf32>
      "tpu.trace_stop"() : () -> ()
      %71 = vector.extract_strided_slice %70 {offsets = [0, 0, 0], sizes = [1, 8, 16], strides = [1, 1, 1]} : vector<2x8x16xf32> to vector<1x8x16xf32>
      %72 = vector.shape_cast %71 : vector<1x8x16xf32> to vector<8x16xf32>
      %73 = arith.truncf %72 : vector<8x16xf32> to vector<8x16xbf16>
      %74 = vector.extract_strided_slice %70 {offsets = [1, 0, 0], sizes = [1, 8, 16], strides = [1, 1, 1]} : vector<2x8x16xf32> to vector<1x8x16xf32>
      %75 = vector.shape_cast %74 : vector<1x8x16xf32> to vector<8x16xf32>
      %76 = arith.truncf %75 : vector<8x16xf32> to vector<8x16xbf16>
      %77 = tpu.concatenate %73, %76 in 1 : vector<8x16xbf16>, vector<8x16xbf16> -> vector<8x32xbf16>
      %c0_53 = arith.constant 0 : index
      %c0_54 = arith.constant 0 : index
      %78 = vector.load %arg5[%c0_53, %c0_54] : memref<8x32xbf16, #tpu.memory_space<vmem>>, vector<8x32xbf16>
      tpu.vector_store %arg5[%c0_53, %c0_54], %77 {strides = array<i32>} : memref<8x32xbf16, #tpu.memory_space<vmem>>, vector<8x32xbf16>,
    } else {
    }
    return
  }
  func.func @transform_0(%arg0: i32, %arg1: i32) -> (i32, i32, i32) {
    %c0_i32 = arith.constant 0 : i32
    %c0_i32_0 = arith.constant 0 : i32
    %c0_i32_1 = arith.constant 0 : i32
    return %c0_i32, %arg0, %c0_i32_0 : i32, i32, i32
  }
  func.func @transform_1(%arg0: i32, %arg1: i32) -> (i32, i32, i32) {
    %c0_i32 = arith.constant 0 : i32
    %c0_i32_0 = arith.constant 0 : i32
    %c0_i32_1 = arith.constant 0 : i32
    return %c0_i32, %arg1, %c0_i32_0 : i32, i32, i32
  }
  func.func @transform_2(%arg0: i32, %arg1: i32) -> (i32, i32, i32) {
    %c0_i32 = arith.constant 0 : i32
    %c0_i32_0 = arith.constant 0 : i32
    %c0_i32_1 = arith.constant 0 : i32
    return %c0_i32, %arg1, %c0_i32_0 : i32, i32, i32
  }
  func.func @transform_3(%arg0: i32, %arg1: i32) -> (i32, i32) {
    %c0_i32 = arith.constant 0 : i32
    %c0_i32_0 = arith.constant 0 : i32
    return %arg0, %c0_i32 : i32, i32
  }
}

module attributes {stable_mosaic.version = 11 : i64} {
  func.func @_out_gate_kernel(%arg0: i32, %arg1: i32, %arg2: memref<16x32xbf16, #tpu.memory_space<vmem>>, %arg3: memref<16x32xbf16, #tpu.memory_space<vmem>>, %arg4: memref<16x32xf32, #tpu.memory_space<vmem>>, %arg5: memref<32x32xbf16, #tpu.memory_space<vmem>>, %arg6: memref<1x32xf32, #tpu.memory_space<vmem>>, %arg7: memref<16x32xf32, #tpu.memory_space<vmem>>, %arg8: memref<16x32xf32, #tpu.memory_space<vmem>>, %arg9: memref<16x32xf32, #tpu.memory_space<vmem>>) attributes {dimension_semantics = [#tpu.dimension_semantics<parallel>, #tpu.dimension_semantics<arbitrary>], iteration_bounds = array<i64: 1, 1>, scalar_prefetch = 0 : i64, scratch_operands = 2 : i64, tpu.core_type = #tpu.core_type<tc>, window_params = [{transform_indices = @transform_0, window_bounds = array<i64: 16, 32>}, {transform_indices = @transform_1, window_bounds = array<i64: 16, 32>}, {transform_indices = @transform_2, window_bounds = array<i64: 16, 32>}, {transform_indices = @transform_3, window_bounds = array<i64: 32, 32>}, {pipeline_mode = #tpu.pipeline_mode<synchronous>, transform_indices = @transform_4, window_bounds = array<i64: 1, 32>}, {transform_indices = @transform_5, window_bounds = array<i64: 16, 32>}]} {
    %c0_i32 = arith.constant 0 : i32
    %0 = arith.cmpi eq, %arg1, %c0_i32 : i32
    %1 = arith.extui %0 : i1 to i32
    %c0_i32_0 = arith.constant 0 : i32
    %2 = arith.cmpi ne, %1, %c0_i32_0 : i32
    scf.if %2 {
      %cst_17 = arith.constant 0.000000e+00 : f32
      %17 = vector.broadcast %cst_17 : f32 to vector<16x32xf32>
      %c0_18 = arith.constant 0 : index
      %c0_19 = arith.constant 0 : index
      %18 = vector.load %arg8[%c0_18, %c0_19] : memref<16x32xf32, #tpu.memory_space<vmem>>, vector<16x32xf32>
      tpu.vector_store %arg8[%c0_18, %c0_19], %17 {strides = array<i32>} : memref<16x32xf32, #tpu.memory_space<vmem>>, vector<16x32xf32>,
      %cst_20 = arith.constant 0.000000e+00 : f32
      %19 = vector.broadcast %cst_20 : f32 to vector<16x32xf32>
      %c0_21 = arith.constant 0 : index
      %c0_22 = arith.constant 0 : index
      %20 = vector.load %arg9[%c0_21, %c0_22] : memref<16x32xf32, #tpu.memory_space<vmem>>, vector<16x32xf32>
      tpu.vector_store %arg9[%c0_21, %c0_22], %19 {strides = array<i32>} : memref<16x32xf32, #tpu.memory_space<vmem>>, vector<16x32xf32>,
    } else {
    }
    %c0 = arith.constant 0 : index
    %c0_1 = arith.constant 0 : index
    %3 = vector.load %arg5[%c0, %c0_1] : memref<32x32xbf16, #tpu.memory_space<vmem>>, vector<32x32xbf16>
    %c0_2 = arith.constant 0 : index
    %c0_3 = arith.constant 0 : index
    %4 = vector.load %arg8[%c0_2, %c0_3] : memref<16x32xf32, #tpu.memory_space<vmem>>, vector<16x32xf32>
    %c0_4 = arith.constant 0 : index
    %c0_5 = arith.constant 0 : index
    %5 = vector.load %arg2[%c0_4, %c0_5] : memref<16x32xbf16, #tpu.memory_space<vmem>>, vector<16x32xbf16>
    %cst = arith.constant dense<0.000000e+00> : vector<16x32xf32>
    %6 = tpu.matmul %5, %3, %cst {dimension_numbers = #tpu.dot_dimension_numbers<[1], [0], [0], [1], [0, 0, 1, 1], [], []>} : vector<16x32xbf16>, vector<32x32xbf16>, vector<16x32xf32> -> vector<16x32xf32>
    %7 = arith.addf %4, %6 : vector<16x32xf32>
    %c0_6 = arith.constant 0 : index
    %c0_7 = arith.constant 0 : index
    %8 = vector.load %arg8[%c0_6, %c0_7] : memref<16x32xf32, #tpu.memory_space<vmem>>, vector<16x32xf32>
    tpu.vector_store %arg8[%c0_6, %c0_7], %7 {strides = array<i32>} : memref<16x32xf32, #tpu.memory_space<vmem>>, vector<16x32xf32>,
    %c0_8 = arith.constant 0 : index
    %c0_9 = arith.constant 0 : index
    %9 = vector.load %arg9[%c0_8, %c0_9] : memref<16x32xf32, #tpu.memory_space<vmem>>, vector<16x32xf32>
    %c0_10 = arith.constant 0 : index
    %c0_11 = arith.constant 0 : index
    %10 = vector.load %arg3[%c0_10, %c0_11] : memref<16x32xbf16, #tpu.memory_space<vmem>>, vector<16x32xbf16>
    %cst_12 = arith.constant dense<0.000000e+00> : vector<16x32xf32>
    %11 = tpu.matmul %10, %3, %cst_12 {dimension_numbers = #tpu.dot_dimension_numbers<[1], [0], [0], [1], [0, 0, 1, 1], [], []>} : vector<16x32xbf16>, vector<32x32xbf16>, vector<16x32xf32> -> vector<16x32xf32>
    %12 = arith.addf %9, %11 : vector<16x32xf32>
    %c0_13 = arith.constant 0 : index
    %c0_14 = arith.constant 0 : index
    %13 = vector.load %arg9[%c0_13, %c0_14] : memref<16x32xf32, #tpu.memory_space<vmem>>, vector<16x32xf32>
    tpu.vector_store %arg9[%c0_13, %c0_14], %12 {strides = array<i32>} : memref<16x32xf32, #tpu.memory_space<vmem>>, vector<16x32xf32>,
    %c0_i32_15 = arith.constant 0 : i32
    %14 = arith.cmpi eq, %arg1, %c0_i32_15 : i32
    %15 = arith.extui %14 : i1 to i32
    %c0_i32_16 = arith.constant 0 : i32
    %16 = arith.cmpi ne, %15, %c0_i32_16 : i32
    scf.if %16 {
      %c0_17 = arith.constant 0 : index
      %c0_18 = arith.constant 0 : index
      %17 = vector.load %arg4[%c0_17, %c0_18] : memref<16x32xf32, #tpu.memory_space<vmem>>, vector<16x32xf32>
      %18 = arith.negf %17 : vector<16x32xf32>
      %19 = math.exp %18 : vector<16x32xf32>
      %cst_19 = arith.constant 1.000000e+00 : f32
      %20 = vector.broadcast %cst_19 : f32 to vector<16x32xf32>
      %21 = arith.addf %20, %19 : vector<16x32xf32>
      %22 = arith.divf %20, %21 : vector<16x32xf32>
      %c0_20 = arith.constant 0 : index
      %c0_21 = arith.constant 0 : index
      %23 = vector.load %arg9[%c0_20, %c0_21] : memref<16x32xf32, #tpu.memory_space<vmem>>, vector<16x32xf32>
      %c0_22 = arith.constant 0 : index
      %c0_23 = arith.constant 0 : index
      %24 = vector.load %arg6[%c0_22, %c0_23] : memref<1x32xf32, #tpu.memory_space<vmem>>, vector<1x32xf32>
      %25 = vector.broadcast %24 : vector<1x32xf32> to vector<16x32xf32>
      %26 = arith.addf %23, %25 : vector<16x32xf32>
      %c0_24 = arith.constant 0 : index
      %c0_25 = arith.constant 0 : index
      %27 = vector.load %arg8[%c0_24, %c0_25] : memref<16x32xf32, #tpu.memory_space<vmem>>, vector<16x32xf32>
      %c0_26 = arith.constant 0 : index
      %c0_27 = arith.constant 0 : index
      %28 = vector.load %arg9[%c0_26, %c0_27] : memref<16x32xf32, #tpu.memory_space<vmem>>, vector<16x32xf32>
      %29 = arith.subf %27, %28 : vector<16x32xf32>
      %30 = arith.mulf %22, %29 : vector<16x32xf32>
      %31 = arith.addf %26, %30 : vector<16x32xf32>
      %c0_28 = arith.constant 0 : index
      %c0_29 = arith.constant 0 : index
      %32 = vector.load %arg7[%c0_28, %c0_29] : memref<16x32xf32, #tpu.memory_space<vmem>>, vector<16x32xf32>
      tpu.vector_store %arg7[%c0_28, %c0_29], %31 {strides = array<i32>} : memref<16x32xf32, #tpu.memory_space<vmem>>, vector<16x32xf32>,
    } else {
    }
    return
  }
  func.func @transform_0(%arg0: i32, %arg1: i32) -> (i32, i32) {
    %c0_i32 = arith.constant 0 : i32
    return %arg0, %arg1 : i32, i32
  }
  func.func @transform_1(%arg0: i32, %arg1: i32) -> (i32, i32) {
    %c0_i32 = arith.constant 0 : i32
    return %arg0, %arg1 : i32, i32
  }
  func.func @transform_2(%arg0: i32, %arg1: i32) -> (i32, i32) {
    %c0_i32 = arith.constant 0 : i32
    %c0_i32_0 = arith.constant 0 : i32
    return %arg0, %c0_i32 : i32, i32
  }
  func.func @transform_3(%arg0: i32, %arg1: i32) -> (i32, i32) {
    %c0_i32 = arith.constant 0 : i32
    %c0_i32_0 = arith.constant 0 : i32
    return %arg1, %c0_i32 : i32, i32
  }
  func.func @transform_4(%arg0: i32, %arg1: i32) -> (i32, i32) {
    %c0_i32 = arith.constant 0 : i32
    %c0_i32_0 = arith.constant 0 : i32
    %c0_i32_1 = arith.constant 0 : i32
    return %c0_i32, %c0_i32_0 : i32, i32
  }
  func.func @transform_5(%arg0: i32, %arg1: i32) -> (i32, i32) {
    %c0_i32 = arith.constant 0 : i32
    %c0_i32_0 = arith.constant 0 : i32
    return %arg0, %c0_i32 : i32, i32
  }
}

module attributes {stable_mosaic.version = 11 : i64} {
  func.func @_flash_attn_kernel(%arg0: i32, %arg1: i32, %arg2: i32, %arg3: memref<2x8x16xbf16, #tpu.memory_space<vmem>>, %arg4: memref<2x8x16xbf16, #tpu.memory_space<vmem>>, %arg5: memref<2x8x16xbf16, #tpu.memory_space<vmem>>, %arg6: memref<8x32xbf16, #tpu.memory_space<vmem>>, %arg7: memref<2x8x1xf32, #tpu.memory_space<vmem>>, %arg8: memref<2x8x1xf32, #tpu.memory_space<vmem>>, %arg9: memref<2x8x16xf32, #tpu.memory_space<vmem>>) attributes {dimension_semantics = [#tpu.dimension_semantics<parallel>, #tpu.dimension_semantics<parallel>, #tpu.dimension_semantics<arbitrary>], iteration_bounds = array<i64: 2, 1, 1>, scalar_prefetch = 0 : i64, scratch_operands = 3 : i64, tpu.core_type = #tpu.core_type<tc>, window_params = [{transform_indices = @transform_0, window_bounds = array<i64: 2, 8, 16>}, {transform_indices = @transform_1, window_bounds = array<i64: 2, 8, 16>}, {transform_indices = @transform_2, window_bounds = array<i64: 2, 8, 16>}, {transform_indices = @transform_3, window_bounds = array<i64: 8, 32>}]} {
    %c0_i32 = arith.constant 0 : i32
    %0 = arith.cmpi eq, %arg2, %c0_i32 : i32
    %1 = arith.extui %0 : i1 to i32
    %c0_i32_0 = arith.constant 0 : i32
    %2 = arith.cmpi ne, %1, %c0_i32_0 : i32
    scf.if %2 {
      %cst_33 = arith.constant 0xFF800000 : f32
      %35 = vector.broadcast %cst_33 : f32 to vector<2x8x1xf32>
      %c0_34 = arith.constant 0 : index
      %c0_35 = arith.constant 0 : index
      %c0_36 = arith.constant 0 : index
      %36 = vector.load %arg7[%c0_34, %c0_35, %c0_36] : memref<2x8x1xf32, #tpu.memory_space<vmem>>, vector<2x8x1xf32>
      tpu.vector_store %arg7[%c0_34, %c0_35, %c0_36], %35 {strides = array<i32>} : memref<2x8x1xf32, #tpu.memory_space<vmem>>, vector<2x8x1xf32>,
      %cst_37 = arith.constant 0.000000e+00 : f32
      %37 = vector.broadcast %cst_37 : f32 to vector<2x8x1xf32>
      %c0_38 = arith.constant 0 : index
      %c0_39 = arith.constant 0 : index
      %c0_40 = arith.constant 0 : index
      %38 = vector.load %arg8[%c0_38, %c0_39, %c0_40] : memref<2x8x1xf32, #tpu.memory_space<vmem>>, vector<2x8x1xf32>
      tpu.vector_store %arg8[%c0_38, %c0_39, %c0_40], %37 {strides = array<i32>} : memref<2x8x1xf32, #tpu.memory_space<vmem>>, vector<2x8x1xf32>,
      %cst_41 = arith.constant 0.000000e+00 : f32
      %39 = vector.broadcast %cst_41 : f32 to vector<2x8x16xf32>
      %c0_42 = arith.constant 0 : index
      %c0_43 = arith.constant 0 : index
      %c0_44 = arith.constant 0 : index
      %40 = vector.load %arg9[%c0_42, %c0_43, %c0_44] : memref<2x8x16xf32, #tpu.memory_space<vmem>>, vector<2x8x16xf32>
      tpu.vector_store %arg9[%c0_42, %c0_43, %c0_44], %39 {strides = array<i32>} : memref<2x8x16xf32, #tpu.memory_space<vmem>>, vector<2x8x16xf32>,
    } else {
    }
    %c0 = arith.constant 0 : index
    %c0_1 = arith.constant 0 : index
    %c0_2 = arith.constant 0 : index
    %3 = vector.load %arg3[%c0, %c0_1, %c0_2] : memref<2x8x16xbf16, #tpu.memory_space<vmem>>, vector<2x8x16xbf16>
    %c0_3 = arith.constant 0 : index
    %c0_4 = arith.constant 0 : index
    %c0_5 = arith.constant 0 : index
    %4 = vector.load %arg4[%c0_3, %c0_4, %c0_5] : memref<2x8x16xbf16, #tpu.memory_space<vmem>>, vector<2x8x16xbf16>
    %c0_6 = arith.constant 0 : index
    %c0_7 = arith.constant 0 : index
    %c0_8 = arith.constant 0 : index
    %5 = vector.load %arg5[%c0_6, %c0_7, %c0_8] : memref<2x8x16xbf16, #tpu.memory_space<vmem>>, vector<2x8x16xbf16>
    "tpu.trace_start"() <{level = 10 : i32, message = "hqd,hkd->hqk"}> : () -> ()
    %cst = arith.constant dense<0.000000e+00> : vector<2x8x8xf32>
    %6 = tpu.matmul %3, %4, %cst {dimension_numbers = #tpu.dot_dimension_numbers<[2], [2], [1], [1], [0, 0, 0, 1, 1, 1], [0], [0]>} : vector<2x8x16xbf16>, vector<2x8x16xbf16>, vector<2x8x8xf32> -> vector<2x8x8xf32>
    "tpu.trace_stop"() : () -> ()
    %cst_9 = arith.constant 2.500000e-01 : f32
    %7 = vector.broadcast %cst_9 : f32 to vector<2x8x8xf32>
    %8 = arith.mulf %6, %7 : vector<2x8x8xf32>
    %c0_10 = arith.constant 0 : index
    %c0_11 = arith.constant 0 : index
    %c0_12 = arith.constant 0 : index
    %9 = vector.load %arg7[%c0_10, %c0_11, %c0_12] : memref<2x8x1xf32, #tpu.memory_space<vmem>>, vector<2x8x1xf32>
    %cst_13 = arith.constant dense<0xFF800000> : vector<2x8xf32>
    %10 = vector.multi_reduction <maximumf>, %8, %cst_13 [2] : vector<2x8x8xf32> to vector<2x8xf32>
    %11 = vector.shape_cast %10 : vector<2x8xf32> to vector<2x8x1xf32>
    %12 = arith.maximumf %9, %11 : vector<2x8x1xf32>
    %13 = arith.subf %9, %12 : vector<2x8x1xf32>
    %14 = math.exp %13 : vector<2x8x1xf32>
    %15 = vector.broadcast %12 : vector<2x8x1xf32> to vector<2x8x8xf32>
    %16 = arith.subf %8, %15 : vector<2x8x8xf32>
    %17 = math.exp %16 : vector<2x8x8xf32>
    %c0_14 = arith.constant 0 : index
    %c0_15 = arith.constant 0 : index
    %c0_16 = arith.constant 0 : index
    %18 = vector.load %arg8[%c0_14, %c0_15, %c0_16] : memref<2x8x1xf32, #tpu.memory_space<vmem>>, vector<2x8x1xf32>
    %19 = arith.mulf %14, %18 : vector<2x8x1xf32>
    %cst_17 = arith.constant dense<0.000000e+00> : vector<2x8xf32>
    %20 = vector.multi_reduction <add>, %17, %cst_17 [2] : vector<2x8x8xf32> to vector<2x8xf32>
    %21 = vector.shape_cast %20 : vector<2x8xf32> to vector<2x8x1xf32>
    %22 = arith.addf %19, %21 : vector<2x8x1xf32>
    %c0_18 = arith.constant 0 : index
    %c0_19 = arith.constant 0 : index
    %c0_20 = arith.constant 0 : index
    %23 = vector.load %arg8[%c0_18, %c0_19, %c0_20] : memref<2x8x1xf32, #tpu.memory_space<vmem>>, vector<2x8x1xf32>
    tpu.vector_store %arg8[%c0_18, %c0_19, %c0_20], %22 {strides = array<i32>} : memref<2x8x1xf32, #tpu.memory_space<vmem>>, vector<2x8x1xf32>,
    %c0_21 = arith.constant 0 : index
    %c0_22 = arith.constant 0 : index
    %c0_23 = arith.constant 0 : index
    %24 = vector.load %arg9[%c0_21, %c0_22, %c0_23] : memref<2x8x16xf32, #tpu.memory_space<vmem>>, vector<2x8x16xf32>
    %25 = vector.broadcast %14 : vector<2x8x1xf32> to vector<2x8x16xf32>
    %26 = arith.mulf %25, %24 : vector<2x8x16xf32>
    %27 = arith.truncf %17 : vector<2x8x8xf32> to vector<2x8x8xbf16>
    "tpu.trace_start"() <{level = 10 : i32, message = "hqk,hkd->hqd"}> : () -> ()
    %cst_24 = arith.constant dense<0.000000e+00> : vector<2x8x16xf32>
    %28 = tpu.matmul %27, %5, %cst_24 {dimension_numbers = #tpu.dot_dimension_numbers<[2], [1], [1], [2], [0, 0, 0, 1, 1, 2], [0], [0]>} : vector<2x8x8xbf16>, vector<2x8x16xbf16>, vector<2x8x16xf32> -> vector<2x8x16xf32>
    "tpu.trace_stop"() : () -> ()
    %29 = arith.addf %26, %28 : vector<2x8x16xf32>
    %c0_25 = arith.constant 0 : index
    %c0_26 = arith.constant 0 : index
    %c0_27 = arith.constant 0 : index
    %30 = vector.load %arg9[%c0_25, %c0_26, %c0_27] : memref<2x8x16xf32, #tpu.memory_space<vmem>>, vector<2x8x16xf32>
    tpu.vector_store %arg9[%c0_25, %c0_26, %c0_27], %29 {strides = array<i32>} : memref<2x8x16xf32, #tpu.memory_space<vmem>>, vector<2x8x16xf32>,
    %c0_28 = arith.constant 0 : index
    %c0_29 = arith.constant 0 : index
    %c0_30 = arith.constant 0 : index
    %31 = vector.load %arg7[%c0_28, %c0_29, %c0_30] : memref<2x8x1xf32, #tpu.memory_space<vmem>>, vector<2x8x1xf32>
    tpu.vector_store %arg7[%c0_28, %c0_29, %c0_30], %12 {strides = array<i32>} : memref<2x8x1xf32, #tpu.memory_space<vmem>>, vector<2x8x1xf32>,
    %c0_i32_31 = arith.constant 0 : i32
    %32 = arith.cmpi eq, %arg2, %c0_i32_31 : i32
    %33 = arith.extui %32 : i1 to i32
    %c0_i32_32 = arith.constant 0 : i32
    %34 = arith.cmpi ne, %33, %c0_i32_32 : i32
    scf.if %34 {
      %c0_33 = arith.constant 0 : index
      %c0_34 = arith.constant 0 : index
      %c0_35 = arith.constant 0 : index
      %35 = vector.load %arg8[%c0_33, %c0_34, %c0_35] : memref<2x8x1xf32, #tpu.memory_space<vmem>>, vector<2x8x1xf32>
      %36 = tpu.reciprocal %35 {approx = true} : vector<2x8x1xf32> -> vector<2x8x1xf32>
      %c0_36 = arith.constant 0 : index
      %c0_37 = arith.constant 0 : index
      %c0_38 = arith.constant 0 : index
      %37 = vector.load %arg9[%c0_36, %c0_37, %c0_38] : memref<2x8x16xf32, #tpu.memory_space<vmem>>, vector<1x8x16xf32>
      %38 = vector.shape_cast %37 : vector<1x8x16xf32> to vector<8x16xf32>
      %39 = vector.extract_strided_slice %36 {offsets = [0, 0, 0], sizes = [1, 8, 1], strides = [1, 1, 1]} : vector<2x8x1xf32> to vector<1x8x1xf32>
      %40 = vector.shape_cast %39 : vector<1x8x1xf32> to vector<8x1xf32>
      %41 = vector.broadcast %40 : vector<8x1xf32> to vector<8x16xf32>
      %42 = arith.mulf %38, %41 : vector<8x16xf32>
      %43 = arith.truncf %42 : vector<8x16xf32> to vector<8x16xbf16>
      %c1 = arith.constant 1 : index
      %c0_39 = arith.constant 0 : index
      %c0_40 = arith.constant 0 : index
      %44 = vector.load %arg9[%c1, %c0_39, %c0_40] : memref<2x8x16xf32, #tpu.memory_space<vmem>>, vector<1x8x16xf32>
      %45 = vector.shape_cast %44 : vector<1x8x16xf32> to vector<8x16xf32>
      %46 = vector.extract_strided_slice %36 {offsets = [1, 0, 0], sizes = [1, 8, 1], strides = [1, 1, 1]} : vector<2x8x1xf32> to vector<1x8x1xf32>
      %47 = vector.shape_cast %46 : vector<1x8x1xf32> to vector<8x1xf32>
      %48 = vector.broadcast %47 : vector<8x1xf32> to vector<8x16xf32>
      %49 = arith.mulf %45, %48 : vector<8x16xf32>
      %50 = arith.truncf %49 : vector<8x16xf32> to vector<8x16xbf16>
      %51 = tpu.concatenate %43, %50 in 1 : vector<8x16xbf16>, vector<8x16xbf16> -> vector<8x32xbf16>
      %c0_41 = arith.constant 0 : index
      %c0_42 = arith.constant 0 : index
      %52 = vector.load %arg6[%c0_41, %c0_42] : memref<8x32xbf16, #tpu.memory_space<vmem>>, vector<8x32xbf16>
      tpu.vector_store %arg6[%c0_41, %c0_42], %51 {strides = array<i32>} : memref<8x32xbf16, #tpu.memory_space<vmem>>, vector<8x32xbf16>,
    } else {
    }
    return
  }
  func.func @transform_0(%arg0: i32, %arg1: i32, %arg2: i32) -> (i32, i32, i32) {
    %c1_i32 = arith.constant 1 : i32
    %0 = arith.muli %arg0, %c1_i32 : i32
    %1 = arith.addi %0, %arg1 : i32
    %c0_i32 = arith.constant 0 : i32
    %c0_i32_0 = arith.constant 0 : i32
    %c0_i32_1 = arith.constant 0 : i32
    return %c0_i32, %1, %c0_i32_0 : i32, i32, i32
  }
  func.func @transform_1(%arg0: i32, %arg1: i32, %arg2: i32) -> (i32, i32, i32) {
    %c1_i32 = arith.constant 1 : i32
    %0 = arith.muli %arg0, %c1_i32 : i32
    %1 = arith.addi %0, %arg2 : i32
    %c0_i32 = arith.constant 0 : i32
    %c0_i32_0 = arith.constant 0 : i32
    %c0_i32_1 = arith.constant 0 : i32
    return %c0_i32, %1, %c0_i32_0 : i32, i32, i32
  }
  func.func @transform_2(%arg0: i32, %arg1: i32, %arg2: i32) -> (i32, i32, i32) {
    %c1_i32 = arith.constant 1 : i32
    %0 = arith.muli %arg0, %c1_i32 : i32
    %1 = arith.addi %0, %arg2 : i32
    %c0_i32 = arith.constant 0 : i32
    %c0_i32_0 = arith.constant 0 : i32
    %c0_i32_1 = arith.constant 0 : i32
    return %c0_i32, %1, %c0_i32_0 : i32, i32, i32
  }
  func.func @transform_3(%arg0: i32, %arg1: i32, %arg2: i32) -> (i32, i32) {
    %c1_i32 = arith.constant 1 : i32
    %0 = arith.muli %arg0, %c1_i32 : i32
    %1 = arith.addi %0, %arg1 : i32
    %c0_i32 = arith.constant 0 : i32
    %c0_i32_0 = arith.constant 0 : i32
    return %1, %c0_i32 : i32, i32
  }
}

module attributes {stable_mosaic.version = 11 : i64} {
  func.func @_proj_kernel(%arg0: i32, %arg1: i32, %arg2: memref<16x32xf32, #tpu.memory_space<vmem>>, %arg3: memref<32x128xbf16, #tpu.memory_space<vmem>>, %arg4: memref<2x16x16xbf16, #tpu.memory_space<vmem>>, %arg5: memref<2x16x16xbf16, #tpu.memory_space<vmem>>, %arg6: memref<2x16x16xbf16, #tpu.memory_space<vmem>>, %arg7: memref<16x32xf32, #tpu.memory_space<vmem>>, %arg8: memref<16x128xf32, #tpu.memory_space<vmem>>) attributes {dimension_semantics = [#tpu.dimension_semantics<parallel>, #tpu.dimension_semantics<arbitrary>], iteration_bounds = array<i64: 1, 1>, scalar_prefetch = 0 : i64, scratch_operands = 1 : i64, tpu.core_type = #tpu.core_type<tc>, window_params = [{transform_indices = @transform_0, window_bounds = array<i64: 16, 32>}, {transform_indices = @transform_1, window_bounds = array<i64: 32, 128>}, {transform_indices = @transform_2, window_bounds = array<i64: 2, 16, 16>}, {transform_indices = @transform_3, window_bounds = array<i64: 2, 16, 16>}, {transform_indices = @transform_4, window_bounds = array<i64: 2, 16, 16>}, {transform_indices = @transform_5, window_bounds = array<i64: 16, 32>}]} {
    %c0_i32 = arith.constant 0 : i32
    %0 = arith.cmpi eq, %arg1, %c0_i32 : i32
    %1 = arith.extui %0 : i1 to i32
    %c0_i32_0 = arith.constant 0 : i32
    %2 = arith.cmpi ne, %1, %c0_i32_0 : i32
    scf.if %2 {
      %cst_10 = arith.constant 0.000000e+00 : f32
      %13 = vector.broadcast %cst_10 : f32 to vector<16x128xf32>
      %c0_11 = arith.constant 0 : index
      %c0_12 = arith.constant 0 : index
      %14 = vector.load %arg8[%c0_11, %c0_12] : memref<16x128xf32, #tpu.memory_space<vmem>>, vector<16x128xf32>
      tpu.vector_store %arg8[%c0_11, %c0_12], %13 {strides = array<i32>} : memref<16x128xf32, #tpu.memory_space<vmem>>, vector<16x128xf32>,
    } else {
    }
    %c0 = arith.constant 0 : index
    %c0_1 = arith.constant 0 : index
    %3 = vector.load %arg8[%c0, %c0_1] : memref<16x128xf32, #tpu.memory_space<vmem>>, vector<16x128xf32>
    %c0_2 = arith.constant 0 : index
    %c0_3 = arith.constant 0 : index
    %4 = vector.load %arg2[%c0_2, %c0_3] : memref<16x32xf32, #tpu.memory_space<vmem>>, vector<16x32xf32>
    %5 = arith.truncf %4 : vector<16x32xf32> to vector<16x32xbf16>
    %c0_4 = arith.constant 0 : index
    %c0_5 = arith.constant 0 : index
    %6 = vector.load %arg3[%c0_4, %c0_5] : memref<32x128xbf16, #tpu.memory_space<vmem>>, vector<32x128xbf16>
    %cst = arith.constant dense<0.000000e+00> : vector<16x128xf32>
    %7 = tpu.matmul %5, %6, %cst {dimension_numbers = #tpu.dot_dimension_numbers<[1], [0], [0], [1], [0, 0, 1, 1], [], []>} : vector<16x32xbf16>, vector<32x128xbf16>, vector<16x128xf32> -> vector<16x128xf32>
    %8 = arith.addf %3, %7 : vector<16x128xf32>
    %c0_6 = arith.constant 0 : index
    %c0_7 = arith.constant 0 : index
    %9 = vector.load %arg8[%c0_6, %c0_7] : memref<16x128xf32, #tpu.memory_space<vmem>>, vector<16x128xf32>
    tpu.vector_store %arg8[%c0_6, %c0_7], %8 {strides = array<i32>} : memref<16x128xf32, #tpu.memory_space<vmem>>, vector<16x128xf32>,
    %c0_i32_8 = arith.constant 0 : i32
    %10 = arith.cmpi eq, %arg1, %c0_i32_8 : i32
    %11 = arith.extui %10 : i1 to i32
    %c0_i32_9 = arith.constant 0 : i32
    %12 = arith.cmpi ne, %11, %c0_i32_9 : i32
    scf.if %12 {
      %c0_10 = arith.constant 0 : index
      %c0_11 = arith.constant 0 : index
      %13 = vector.load %arg8[%c0_10, %c0_11] : memref<16x128xf32, #tpu.memory_space<vmem>>, vector<16x128xf32>
      %14 = vector.extract_strided_slice %13 {offsets = [0, 0], sizes = [16, 16], strides = [1, 1]} : vector<16x128xf32> to vector<16x16xf32>
      %15 = arith.truncf %14 : vector<16x16xf32> to vector<16x16xbf16>
      %c0_12 = arith.constant 0 : index
      %c0_13 = arith.constant 0 : index
      %c0_14 = arith.constant 0 : index
      %16 = vector.load %arg4[%c0_12, %c0_13, %c0_14] : memref<2x16x16xbf16, #tpu.memory_space<vmem>>, vector<1x16x16xbf16>
      %17 = vector.shape_cast %16 : vector<1x16x16xbf16> to vector<16x16xbf16>
      %18 = vector.shape_cast %15 : vector<16x16xbf16> to vector<1x16x16xbf16>
      tpu.vector_store %arg4[%c0_12, %c0_13, %c0_14], %18 {strides = array<i32>} : memref<2x16x16xbf16, #tpu.memory_space<vmem>>, vector<1x16x16xbf16>,
      %19 = vector.extract_strided_slice %13 {offsets = [0, 32], sizes = [16, 16], strides = [1, 1]} : vector<16x128xf32> to vector<16x16xf32>
      %20 = arith.truncf %19 : vector<16x16xf32> to vector<16x16xbf16>
      %c0_15 = arith.constant 0 : index
      %c0_16 = arith.constant 0 : index
      %c0_17 = arith.constant 0 : index
      %21 = vector.load %arg5[%c0_15, %c0_16, %c0_17] : memref<2x16x16xbf16, #tpu.memory_space<vmem>>, vector<1x16x16xbf16>
      %22 = vector.shape_cast %21 : vector<1x16x16xbf16> to vector<16x16xbf16>
      %23 = vector.shape_cast %20 : vector<16x16xbf16> to vector<1x16x16xbf16>
      tpu.vector_store %arg5[%c0_15, %c0_16, %c0_17], %23 {strides = array<i32>} : memref<2x16x16xbf16, #tpu.memory_space<vmem>>, vector<1x16x16xbf16>,
      %24 = vector.extract_strided_slice %13 {offsets = [0, 64], sizes = [16, 16], strides = [1, 1]} : vector<16x128xf32> to vector<16x16xf32>
      %25 = arith.truncf %24 : vector<16x16xf32> to vector<16x16xbf16>
      %c0_18 = arith.constant 0 : index
      %c0_19 = arith.constant 0 : index
      %c0_20 = arith.constant 0 : index
      %26 = vector.load %arg6[%c0_18, %c0_19, %c0_20] : memref<2x16x16xbf16, #tpu.memory_space<vmem>>, vector<1x16x16xbf16>
      %27 = vector.shape_cast %26 : vector<1x16x16xbf16> to vector<16x16xbf16>
      %28 = vector.shape_cast %25 : vector<16x16xbf16> to vector<1x16x16xbf16>
      tpu.vector_store %arg6[%c0_18, %c0_19, %c0_20], %28 {strides = array<i32>} : memref<2x16x16xbf16, #tpu.memory_space<vmem>>, vector<1x16x16xbf16>,
      %29 = vector.extract_strided_slice %13 {offsets = [0, 16], sizes = [16, 16], strides = [1, 1]} : vector<16x128xf32> to vector<16x16xf32>
      %30 = arith.truncf %29 : vector<16x16xf32> to vector<16x16xbf16>
      %c1 = arith.constant 1 : index
      %c0_21 = arith.constant 0 : index
      %c0_22 = arith.constant 0 : index
      %31 = vector.load %arg4[%c1, %c0_21, %c0_22] : memref<2x16x16xbf16, #tpu.memory_space<vmem>>, vector<1x16x16xbf16>
      %32 = vector.shape_cast %31 : vector<1x16x16xbf16> to vector<16x16xbf16>
      %33 = vector.shape_cast %30 : vector<16x16xbf16> to vector<1x16x16xbf16>
      tpu.vector_store %arg4[%c1, %c0_21, %c0_22], %33 {strides = array<i32>} : memref<2x16x16xbf16, #tpu.memory_space<vmem>>, vector<1x16x16xbf16>,
      %34 = vector.extract_strided_slice %13 {offsets = [0, 48], sizes = [16, 16], strides = [1, 1]} : vector<16x128xf32> to vector<16x16xf32>
      %35 = arith.truncf %34 : vector<16x16xf32> to vector<16x16xbf16>
      %c1_23 = arith.constant 1 : index
      %c0_24 = arith.constant 0 : index
      %c0_25 = arith.constant 0 : index
      %36 = vector.load %arg5[%c1_23, %c0_24, %c0_25] : memref<2x16x16xbf16, #tpu.memory_space<vmem>>, vector<1x16x16xbf16>
      %37 = vector.shape_cast %36 : vector<1x16x16xbf16> to vector<16x16xbf16>
      %38 = vector.shape_cast %35 : vector<16x16xbf16> to vector<1x16x16xbf16>
      tpu.vector_store %arg5[%c1_23, %c0_24, %c0_25], %38 {strides = array<i32>} : memref<2x16x16xbf16, #tpu.memory_space<vmem>>, vector<1x16x16xbf16>,
      %39 = vector.extract_strided_slice %13 {offsets = [0, 80], sizes = [16, 16], strides = [1, 1]} : vector<16x128xf32> to vector<16x16xf32>
      %40 = arith.truncf %39 : vector<16x16xf32> to vector<16x16xbf16>
      %c1_26 = arith.constant 1 : index
      %c0_27 = arith.constant 0 : index
      %c0_28 = arith.constant 0 : index
      %41 = vector.load %arg6[%c1_26, %c0_27, %c0_28] : memref<2x16x16xbf16, #tpu.memory_space<vmem>>, vector<1x16x16xbf16>
      %42 = vector.shape_cast %41 : vector<1x16x16xbf16> to vector<16x16xbf16>
      %43 = vector.shape_cast %40 : vector<16x16xbf16> to vector<1x16x16xbf16>
      tpu.vector_store %arg6[%c1_26, %c0_27, %c0_28], %43 {strides = array<i32>} : memref<2x16x16xbf16, #tpu.memory_space<vmem>>, vector<1x16x16xbf16>,
      %44 = vector.extract_strided_slice %13 {offsets = [0, 96], sizes = [16, 32], strides = [1, 1]} : vector<16x128xf32> to vector<16x32xf32>
      %c0_29 = arith.constant 0 : index
      %c0_30 = arith.constant 0 : index
      %45 = vector.load %arg7[%c0_29, %c0_30] : memref<16x32xf32, #tpu.memory_space<vmem>>, vector<16x32xf32>
      tpu.vector_store %arg7[%c0_29, %c0_30], %44 {strides = array<i32>} : memref<16x32xf32, #tpu.memory_space<vmem>>, vector<16x32xf32>,
    } else {
    }
    return
  }
  func.func @transform_0(%arg0: i32, %arg1: i32) -> (i32, i32) {
    %c0_i32 = arith.constant 0 : i32
    return %arg0, %arg1 : i32, i32
  }
  func.func @transform_1(%arg0: i32, %arg1: i32) -> (i32, i32) {
    %c0_i32 = arith.constant 0 : i32
    %c0_i32_0 = arith.constant 0 : i32
    return %arg1, %c0_i32 : i32, i32
  }
  func.func @transform_2(%arg0: i32, %arg1: i32) -> (i32, i32, i32) {
    %c0_i32 = arith.constant 0 : i32
    %c0_i32_0 = arith.constant 0 : i32
    %c0_i32_1 = arith.constant 0 : i32
    return %c0_i32, %arg0, %c0_i32_0 : i32, i32, i32
  }
  func.func @transform_3(%arg0: i32, %arg1: i32) -> (i32, i32, i32) {
    %c0_i32 = arith.constant 0 : i32
    %c0_i32_0 = arith.constant 0 : i32
    %c0_i32_1 = arith.constant 0 : i32
    return %c0_i32, %arg0, %c0_i32_0 : i32, i32, i32
  }
  func.func @transform_4(%arg0: i32, %arg1: i32) -> (i32, i32, i32) {
    %c0_i32 = arith.constant 0 : i32
    %c0_i32_0 = arith.constant 0 : i32
    %c0_i32_1 = arith.constant 0 : i32
    return %c0_i32, %arg0, %c0_i32_0 : i32, i32, i32
  }
  func.func @transform_5(%arg0: i32, %arg1: i32) -> (i32, i32) {
    %c0_i32 = arith.constant 0 : i32
    %c0_i32_0 = arith.constant 0 : i32
    return %arg0, %c0_i32 : i32, i32
  }
}

</mosaic_0001>

<bundles_post_ra>
// kernel: mablock_forward.5
= control target key start
LH: loop header
LB: loop body
LE: loop exit
PB: predicated region body
PF: predicated region fallthrough
CT: control target
= control target key end

     0   :  { %s980_s12 = smov 0   ;;  %s982_s13 = smov 0   ;;  %s1098_s0 = inlined_call_operand.vmem [shape: bf16[2,16,16], index: 0, kind: input, shape index: {}]   ;;  %s1099_s1 = inlined_call_operand.vmem [shape: bf16[2,16,16], index: 1, kind: input, shape index: {}]   ;;  %s1100_s2 = inlined_call_operand.vmem [shape: bf16[2,16,16], index: 2, kind: input, shape index: {}]   ;;  %s1101_s3 = inlined_call_operand.vmem [shape: bf16[16,32], index: 3, kind: output, shape index: {}]  }
   0x1   :  { %s984_s14 = smov 0   ;;  %s986_s15 = smov 0  }
   0x2   :  { %s988_s16 = smov 0  }
   0x3 LB: > { %s32_s17 = sadd.s32 1, %s949_s15  ;;  %p48_p1 = scmp.ne.s32.totalorder %s941_s13, %s937_s12  ;;  %s953_s16 = sphi %s988_s16, %s13_s16   ;;  %s949_s15 = sphi %s986_s15, %s1106_s15   ;;  %s945_s14 = sphi %s984_s14, %s1105_s14   ;;  %s941_s13 = sphi %s982_s13, %s1104_s13   ;;  %s937_s12 = sphi %s980_s12, %s1103_s12  }
   0x4   : > { %p34_p0 = scmp.ge.s32.totalorder %s32_s17, 2  ;;  %p49_p2 = scmp.eq.s32.totalorder %s953_s16, 0 }
   0x5   : > { %s41_s20 = sadd.s32 1, %s941_s13  ;;  %p806_p5 = scmp.ge.s32.totalorder %s953_s16, 2 }
   0x6   : > { %s1108_s17 = smov (%p34_p0, %s32_s17), 0  ;;  %p1011_p3 = por %p49_p2, %p48_p1 }
   0x7   : > { %s38_s19 = ssub.s32 %s949_s15, %s1108_s17  ;;  %158 = sbr.rel (%p806_p5) target bundleno = 35 (0x23), region = 16 }
   0x8   : > { %p39_p4 = scmp.eq.s32.totalorder %s38_s19, 0 }
   0xa   : > { %s1019_s21 = scalar_select %p39_p4, %s941_s13, %s41_s20  }
   0xe   : > { %161 = sbr.rel (!%p1011_p3) target bundleno = 21 (0x15), region = 20  ;;  %s163_s22 = sand.u32 (%p1011_p3), 1, %s941_s13  }
   0xf   : > { %s808_s23 = sshll.u32 (%p1011_p3), %s949_s15, 2  ;;  %s807_s24 = sshll.u32 (%p1011_p3), %s163_s22, 3 }
  0x10   : > { %s168_s27 = scalar_lea.vmem (%p1011_p3), %s1098_s0, %s808_s23  ;;  %s165_s28 = scalar_lea.vmem (%p1011_p3), [#allocation5], %s807_s24 }
  0x11   : > { %v184_v0 = vld [vmem:[%s168_s27] sm:$0xf] (%p1011_p3)  ;;  %v186_v1 = vld [vmem:[%s168_s27 + $0x8] sm:$0xf] (%p1011_p3) }
  0x12   : > { %185 = vst [vmem:[%s165_s28] sm:$0xf] (%p1011_p3), %v184_v0  ;;  %187 = vst [vmem:[%s165_s28 + $0x4] sm:$0xf] (%p1011_p3), %v186_v1 }
  0x15 PF: > { %214 = sbr.rel (!%p1011_p3) target bundleno = 28 (0x1c), region = 61  ;;  %s216_s29 = sand.u32 (%p1011_p3), 1, %s941_s13  }
  0x16   : > { %s810_s30 = sshll.u32 (%p1011_p3), %s949_s15, 2  ;;  %s809_s4 = sshll.u32 (%p1011_p3), %s216_s29, 3 }
  0x17   : > { %s221_s7 = scalar_lea.vmem (%p1011_p3), %s1099_s1, %s810_s30  ;;  %s218_s8 = scalar_lea.vmem (%p1011_p3), [#allocation6], %s809_s4 }
  0x18   : > { %v237_v2 = vld [vmem:[%s221_s7] sm:$0xf] (%p1011_p3)  ;;  %v239_v3 = vld [vmem:[%s221_s7 + $0x8] sm:$0xf] (%p1011_p3) }
  0x19   : > { %238 = vst [vmem:[%s218_s8] sm:$0xf] (%p1011_p3), %v237_v2  ;;  %240 = vst [vmem:[%s218_s8 + $0x4] sm:$0xf] (%p1011_p3), %v239_v3 }
  0x1c PF: > { %267 = sbr.rel (!%p1011_p3) target bundleno = 35 (0x23), region = 102  ;;  %s269_s9 = sand.u32 (%p1011_p3), 1, %s941_s13  }
  0x1d   : > { %s812_s10 = sshll.u32 (%p1011_p3), %s949_s15, 2  ;;  %s811_s11 = sshll.u32 (%p1011_p3), %s269_s9, 3 }
  0x1e   : > { %s274_s22 = scalar_lea.vmem (%p1011_p3), %s1100_s2, %s812_s10  ;;  %s271_s23 = scalar_lea.vmem (%p1011_p3), [#allocation7], %s811_s11 }
  0x1f   : > { %v290_v4 = vld [vmem:[%s274_s22] sm:$0xf] (%p1011_p3)  ;;  %v292_v5 = vld [vmem:[%s274_s22 + $0x8] sm:$0xf] (%p1011_p3) }
  0x20   : > { %291 = vst [vmem:[%s271_s23] sm:$0xf] (%p1011_p3), %v290_v4  ;;  %293 = vst [vmem:[%s271_s23 + $0x4] sm:$0xf] (%p1011_p3), %v292_v5 }
  0x23 PF: > { %p813_p6 = scmp.ge.s32.totalorder %s953_s16, 1  ;;  %p319_p7 = scmp.lt.s32.totalorder %s953_s16, 3 }
  0x25   : > { %p320_p8 = pnand %p813_p6, %p319_p7 }
  0x26   : > { %s326_s18 = sand.u32 (!%p320_p8), 1, %s937_s12   ;;  %vm390_vm0 = vcmask (!%p320_p8), 130048   ;;  %v955_v6 = vmov (!%p320_p8), 0.0   ;;  %vm956_vm1 = vmmov (!%p320_p8), 0   ;;  %vm385_vm2 = vcmask (!%p320_p8), 7168   ;;  %s959_s27 = smov (!%p320_p8), 16  }
  0x27   : > { %323 = sbr.rel (%p320_p8) target bundleno = 965 (0x3c5), region = 143  ;;  %838 = vmatprep.subr.bf16.mxu1 (!%p320_p8), %v955_v6  ;;  %s1046_s24 = sshll.u32 (!%p320_p8), %s326_s18, 3  ;;  %391 = vst.msk [vmem:[#allocation4] sm:$0xff] (!%p320_p8), %vm390_vm0, %v955_v6  ;;  %392 = vst.msk [vmem:[#allocation4 + $0x8] sm:$0xff] (!%p320_p8), %vm390_vm0, %v955_v6  ;;  %832 = vmatprep.subr.bf16.mxu0 (!%p320_p8), %v955_v6  ;;  %v957_v13 = vmov (!%p320_p8), -inf   ;;  %vm496_vm3 = vcmask (!%p320_p8), 64512  }
  0x28   : > { %840 = vmatprep.mubr.msk.bf16.mxu1 (!%p320_p8), %vm956_vm1, %v955_v6  ;;  %834 = vmatprep.mubr.msk.bf16.mxu0 (!%p320_p8), %vm956_vm1, %v955_v6  ;;  %s335_s25 = scalar_lea.vmem (!%p320_p8), [#allocation6], %s1046_s24  ;;  %s328_s12 = scalar_lea.vmem (!%p320_p8), [#allocation5], %s1046_s24  ;;  %387 = vst.msk [vmem:[#allocation2 + $0x8] sm:$0xff] (!%p320_p8), %vm385_vm2, %v957_v13  ;;  %386 = vst.msk [vmem:[#allocation2] sm:$0xff] (!%p320_p8), %vm385_vm2, %v957_v13  ;;  %v958_v26 = vmov (!%p320_p8), 0   ;;  %vm561_vm4 = vcmask (!%p320_p8), 1043456  }
  0x29   : > { %v396_v7 = vld [vmem:[%s335_s25 + $0x4] sm:$0xf] (!%p320_p8)  ;;  %v395_v8 = vld [vmem:[%s335_s25] sm:$0xf] (!%p320_p8)  ;;  %v394_v11 = vld [vmem:[%s328_s12 + $0x4] sm:$0xf] (!%p320_p8)  ;;  %901 = vset.pattern.permute.xlu1 (!%p320_p8), %v958_v26  ;;  %902 = vset.pattern.permute.xlu0 (!%p320_p8), %v958_v26 }
  0x2a   : > { %v450_v9 = vsel (!%p320_p8), %vm390_vm0, %v396_v7, 0  ;;  %v404_v10 = vsel (!%p320_p8), %vm390_vm0, %v395_v8, 0  ;;  %v393_v12 = vld [vmem:[%s328_s12] sm:$0xf] (!%p320_p8)  ;;  %388 = vst.msk [vmem:[#allocation3] sm:$0xff] (!%p320_p8), %vm385_vm2, %v955_v6  ;;  %389 = vst.msk [vmem:[#allocation3 + $0x8] sm:$0xff] (!%p320_p8), %vm385_vm2, %v955_v6 }
  0x2b   : > { %839 = vmatpush3.bf16.xpose.msra.mxu1 (!%p320_p8), %v450_v9  ;;  %833 = vmatpush3.bf16.xpose.msra.mxu0 (!%p320_p8), %v404_v10  ;;  %s342_s26 = scalar_lea.vmem (!%p320_p8), [#allocation7], %s1046_s24  ;;  %p375_p9 = scmp.lt.s32.totalorder (!%p320_p8), %s945_s14, 1  ;;  %vm688_vm5 = vcmask (!%p320_p8), 257024  }
  0x2c   : > { %850 = vmatprep.subr.bf16.mxu1 (!%p320_p8), %v955_v6  ;;  %844 = vmatprep.subr.bf16.mxu0 (!%p320_p8), %v955_v6  ;;  %v398_v35 = vld [vmem:[%s342_s26 + $0x4] sm:$0xf] (!%p320_p8)  ;;  %v397_v37 = vld [vmem:[%s342_s26] sm:$0xf] (!%p320_p8) }
  0x2d   : > { %v609_v36 = vsel (!%p320_p8), %vm561_vm4, %v398_v35, 0  ;;  %v563_v38 = vsel (!%p320_p8), %vm561_vm4, %v397_v37, 0 }
  0x2e   : > { %v543_v4 = vld [vmem:[#allocation4 + $0x8] sm:$0xff]  ;;  %s1110_s14 = smov (!%p375_p9, %s945_s14), 1 }
  0x2f   : > { %v495_v27 = vld [vmem:[#allocation2 + $0x8] sm:$0xff]  ;;  %v494_v30 = vld [vmem:[#allocation2] sm:$0xff]  ;;  %s817_s28 = sshll.u32 %s1110_s14, 2 }
  0x30   : > { %s378_s4 = scalar_lea.vmem %s1101_s3, %s817_s28 }
  0x31   : > { %v528_v55 = vld [vmem:[#allocation3 + $0x8] sm:$0xff]  ;;  %v527_v58 = vld [vmem:[#allocation3] sm:$0xff] }
  0x32   : > { %841 = vmatmul.mubr.msk.bf16.vlgmr.msra.gmra.mrb[0].mxu1 %vm390_vm0, %v394_v11  ;;  %835 = vmatmul.mubr.msk.bf16.vlgmr.msra.gmra.mrb[0].mxu0 %vm390_vm0, %v393_v12 }
  0x33   : > { %852 = vmatprep.mubr.msk.bf16.mxu1 %vm956_vm1, %v955_v6  ;;  %846 = vmatprep.mubr.msk.bf16.mxu0 %vm956_vm1, %v955_v6  ;;  %v542_v6 = vld [vmem:[#allocation4] sm:$0xff] }
  0x34   : > { %851 = vmatpush3.bf16.msra.mxu1 %v609_v36  ;;  %845 = vmatpush3.bf16.msra.mxu0 %v563_v38 }
 0x105   : > { %v486_v14 = vpop.f32.mrb[0].mxu1  ;;  %v440_v15 = vpop.f32.mrb[0].mxu0 }
 0x106   : > { %v493_v16 = vmul.f32 0.25, %v486_v14  ;;  %v842_v17 = vpop.f32.mrb[1].mxu1  ;;  %v492_v18 = vmul.f32 0.25, %v440_v15  ;;  %v836_v19 = vpop.f32.mrb[1].mxu0 }
 0x107   : > { %v489_v20 = vpop.f32.mrb[2].mxu1  ;;  %v443_v21 = vpop.f32.mrb[2].mxu0 }
 0x108   : > { %v843_v22 = vpop.f32.mrb[3].mxu1  ;;  %v500_v23 = vsel %vm496_vm3, %v493_v16, -inf  ;;  %v837_v24 = vpop.f32.mrb[3].mxu0  ;;  %v497_v25 = vsel %vm496_vm3, %v492_v18, -inf }
 0x109   : > { %501 = vmax.xlane.f32.xlu0 %v500_v23 }
 0x10d   : > { %498 = vmax.xlane.f32.xlu0 %v497_v25 }
 0x196   : > { %v502_v28 = vpop.xlane.xlu0 %501 }
 0x197   : > { %v504_v29 = vmax.f32 %v495_v27, %v502_v28 }
 0x199   : > { %v506_v31 = vsub.f32 %v495_v27, %v504_v29  ;;  %656 = vst.msk [vmem:[#allocation2 + $0x8] sm:$0xff] %vm385_vm2, %v504_v29  ;;  %518 = vperm.xlu1 %901, %v504_v29  }
 0x19a   : > { %v499_v32 = vpop.xlane.xlu0 %498 }
 0x19b   : > { %v503_v33 = vmax.f32 %v494_v30, %v499_v32  ;;  %v509_v51 = vmul.f32 1.442695, %v506_v31 }
 0x19d   : > { %v505_v34 = vsub.f32 %v494_v30, %v503_v33  ;;  %655 = vst.msk [vmem:[#allocation2] sm:$0xff] %vm385_vm2, %v503_v33  ;;  %513 = vperm.xlu1 %901, %v503_v33  }
 0x19f   : > { %v507_v52 = vmul.f32 1.442695, %v505_v34 }
 0x218   : > { %v519_v39 = vpop.permute.xlu1 %518 }
 0x219   : > { %v522_v40 = vsub.f32 %v493_v16, %v519_v39 }
 0x21b   : > { %v525_v41 = vmul.f32 1.442695, %v522_v40 }
 0x21c   : > { %v514_v42 = vpop.permute.xlu1 %513 }
 0x21d   : > { %903 = vpow2.f32 %v525_v41  ;;  %v521_v43 = vsub.f32 %v492_v18, %v514_v42 }
 0x21f   : > { %v523_v44 = vmul.f32 1.442695, %v521_v43 }
 0x221   : > { %905 = vpow2.f32 %v523_v44 }
 0x222   : > { %907 = vpow2.f32 %v509_v51 }
 0x223   : > { %909 = vpow2.f32 %v507_v52 }
 0x227   : > { %v904_v45 = vpop.eup %903 }
 0x228   : > { %v534_v46 = vsel %vm496_vm3, %v904_v45, 0.0  ;;  %v557_v47 = vpack.c.bf16 %v904_v45, %v904_v45 }
 0x229   : > { %535 = vadd.xlane.f32.xlu0 %v534_v46 }
 0x22a   : > { %853 = vmatmul.mubr.msk.bf16.vlgmr.msra.gmra.mrb[4].mxu1 %vm496_vm3, %v557_v47 }
 0x22b   : > { %v906_v48 = vpop.eup %905 }
 0x22c   : > { %v531_v49 = vsel %vm496_vm3, %v906_v48, 0.0  ;;  %v556_v50 = vpack.c.bf16 %v906_v48, %v906_v48  ;;  %v908_v53 = vpop.eup %907 }
 0x22d   : > { %532 = vadd.xlane.f32.xlu1 %v531_v49  ;;  %v910_v54 = vpop.eup %909  ;;  %v530_v56 = vmul.f32 %v908_v53, %v528_v55 }
 0x22e   : > { %847 = vmatmul.mubr.msk.bf16.vlgmr.msra.gmra.mrb[4].mxu0 %vm496_vm3, %v556_v50  ;;  %v529_v60 = vmul.f32 %v910_v54, %v527_v58 }
 0x23f   : > { %551 = vperm.xlu0 %902, %v908_v53  }
 0x243   : > { %546 = vperm.xlu0 %902, %v910_v54  }
 0x2b6   : > { %v536_v57 = vpop.xlane.xlu0 %535 }
 0x2b7   : > { %v538_v59 = vadd.f32 %v536_v57, %v530_v56 }
 0x2b9   : > { %541 = vst.msk [vmem:[#allocation3 + $0x8] sm:$0xff] %vm385_vm2, %v538_v59 }
 0x2ba   : > { %v533_v61 = vpop.xlane.xlu1 %532 }
 0x2bb   : > { %v537_v62 = vadd.f32 %v533_v61, %v529_v60 }
 0x2bd   : > { %540 = vst.msk [vmem:[#allocation3] sm:$0xff] %vm385_vm2, %v537_v62 }
 0x2be   : > { %v552_v3 = vpop.permute.xlu0 %551 }
 0x2bf   : > { %v555_v5 = vmul.f32 %v552_v3, %v543_v4 }
 0x2c0   : > { %v661_v63 = vld [vmem:[#allocation3 + $0x8] sm:$0xff] }
 0x2c1   : > { %911 = vrcp.f32 %v661_v63 }
 0x2c2   : > { %v547_v7 = vpop.permute.xlu0 %546 }
 0x2c3   : > { %v554_v12 = vmul.f32 %v547_v7, %v542_v6 }
 0x2c4   : > { %v660_v0 = vld [vmem:[#allocation3] sm:$0xff] }
 0x2c5   : > { %913 = vrcp.f32 %v660_v0 }
 0x2cb   : > { %v912_v1 = vpop.eup %911 }
 0x2cc   : > { %676 = vperm.xlu1 %901, %v912_v1  }
 0x2cf   : > { %v914_v2 = vpop.eup %913 }
 0x2d0   : > { %667 = vperm.xlu0 %902, %v914_v2  }
 0x2fd   : > { %v645_v8 = vpop.f32.mrb[4].mxu1 }
 0x2fe   : > { %v652_v9 = vadd.f32 %v645_v8, %v555_v5  ;;  %v854_v10 = vpop.f32.mrb[5].mxu1 }
 0x2ff   : > { %v648_v11 = vpop.f32.mrb[6].mxu1 }
 0x300   : > { %654 = vst.msk [vmem:[#allocation4 + $0x8] sm:$0xff] %vm390_vm0, %v652_v9  ;;  %v855_v13 = vpop.f32.mrb[7].mxu1 }
 0x301   : > { %v599_v14 = vpop.f32.mrb[4].mxu0 }
 0x302   : > { %v651_v15 = vadd.f32 %v599_v14, %v554_v12  ;;  %v848_v16 = vpop.f32.mrb[5].mxu0 }
 0x303   : > { %v602_v17 = vpop.f32.mrb[6].mxu0 }
 0x304   : > { %653 = vst.msk [vmem:[#allocation4] sm:$0xff] %vm390_vm0, %v651_v15  ;;  %v849_v18 = vpop.f32.mrb[7].mxu0 }
 0x307   : > { %v673_v20 = vld [vmem:[#allocation4 + $0x8] sm:$0xff] }
 0x30b   : > { %v664_v24 = vld [vmem:[#allocation4] sm:$0xff] }
 0x34b   : > { %v677_v19 = vpop.permute.xlu1 %676 }
 0x34c   : > { %v679_v21 = vmul.f32 %v677_v19, %v673_v20 }
 0x34e   : > { %v680_v22 = vpack.c.bf16 %v679_v21, %v679_v21 }
 0x34f   : > { %v668_v23 = vpop.permute.xlu0 %667 }
 0x350   : > { %682 = vrot.lane.b32.xlu1 %v680_v22, %s959_s27  ;;  %v670_v25 = vmul.f32 %v668_v23, %v664_v24 }
 0x352   : > { %v671_v26 = vpack.c.bf16 %v670_v25, %v670_v25 }
 0x3c2   : > { %v683_v27 = vpop.permute.xlu1 %682 }
 0x3c3   : > { %v686_v28 = vsel %vm390_vm0, %v671_v26, %v683_v27 }
 0x3c4   : > { %689 = vst.msk [vmem:[%s378_s4] sm:$0xf] %vm688_vm5, %v686_v28 }
 0x3c5 PF: > { %s13_s16 = sadd.s32 1, %s953_s16   ;;  %s1103_s12 = smov %s941_s13 }
 0x3c6   : > { %p10_p10 = scmp.ge.s32.totalorder %s13_s16, 4   ;;  %s1104_s13 = smov %s1019_s21 }
 0x3c7   : > { %s1105_s14 = smov %s949_s15  ;;  %s1106_s15 = smov %s1108_s17 }
 0x3c8   :  { %12 = sbr.rel (!%p10_p10) target bundleno = 3 (0x3), region = 215 }

// kernel: mablock_forward.4
= control target key start
LH: loop header
LB: loop body
LE: loop exit
PB: predicated region body
PF: predicated region fallthrough
CT: control target
= control target key end

     0   :  { %11 = vsyncpa [#allocation4], 0  ;;  %s422_s0 = inlined_call_operand.hbm [shape: f32[16,32], index: 0, kind: input, shape index: {}]   ;;  %s423_s1 = inlined_call_operand.hbm [shape: bf16[32,128], index: 1, kind: input, shape index: {}]   ;;  %s424_s2 = inlined_call_operand.vmem [shape: bf16[2,16,16], index: 2, kind: output, shape index: {0}]   ;;  %s425_s3 = inlined_call_operand.vmem [shape: bf16[2,16,16], index: 3, kind: output, shape index: {1}]   ;;  %s426_s4 = inlined_call_operand.vmem [shape: bf16[2,16,16], index: 4, kind: output, shape index: {2}]   ;;  %s427_s5 = inlined_call_operand.vmem [shape: f32[16,32], index: 5, kind: output, shape index: {3}]  }
   0x1   :  { %12 = vsyncpa [#allocation6], 0  ;;  %s294_s18 = smov [#allocation3]   ;;  %s246_s22 = scalar_lea.hbm %s422_s0, 256 }
   0x2   :  { %s18_s19 = sshll.u32 %s294_s18, 4  ;;  %p247_p0 = scmp.ne.s32.totalorder %s422_s0, %s246_s22  ;;  %s19_s19 = int_to_ptr.vmem [resolvable:$true] %s18_s19 }
   0x3   :  { %p250_p1 = scmp.lt.u32.totalorder %s246_s22, %s422_s0 }
   0x5   :  { %p252_p2 = pnand %p250_p1, %p247_p0 }
   0x7   :  { %255 = shalt.err (!%p252_p2)
}
   0x8   :  { %s256_s27 = scalar_lea.vmem %s19_s19, 256  ;;  %p261_p4 = scmp.lt.s32.totalorder %s19_s19, %s19_s19 }
   0x9   :  { %p257_p3 = scmp.ne.s32.totalorder %s19_s19, %s256_s27  ;;  %p262_p5 = scmp.lt.s32.totalorder %s256_s27, %s256_s27 }
   0xb   :  { %p263_p6 = por %p262_p5, %p261_p4 }
   0xd   :  { %p264_p7 = pnand %p263_p6, %p257_p3 }
   0xf   :  { %267 = shalt.err (!%p264_p7)
}
  0x10   :  { %s295_s28 = smov 128   ;;  %s296_s29 = smov 8  }
  0x11   :  { %24 = dma.hbm_to_vmem [thread:$0]  %s422_s0, 256, %s19_s19, [#allocation4], %s295_s28, %s295_s28, %s296_s29  }
  0x12   :  { %s297_s7 = smov [#allocation5]   ;;  %s268_s11 = scalar_lea.hbm %s423_s1, 256 }
  0x13   :  { %s30_s8 = sshll.u32 %s297_s7, 4  ;;  %p269_p8 = scmp.ne.s32.totalorder %s423_s1, %s268_s11  ;;  %s31_s8 = int_to_ptr.vmem [resolvable:$true] %s30_s8 }
  0x14   :  { %p272_p9 = scmp.lt.u32.totalorder %s268_s11, %s423_s1 }
  0x16   :  { %p274_p10 = pnand %p272_p9, %p269_p8 }
  0x18   :  { %277 = shalt.err (!%p274_p10)
}
  0x19   :  { %s278_s16 = scalar_lea.vmem %s31_s8, 256  ;;  %p283_p12 = scmp.lt.s32.totalorder %s31_s8, %s31_s8 }
  0x1a   :  { %p279_p11 = scmp.ne.s32.totalorder %s31_s8, %s278_s16  ;;  %p284_p13 = scmp.lt.s32.totalorder %s278_s16, %s278_s16 }
  0x1c   :  { %p285_p0 = por %p284_p13, %p283_p12 }
  0x1e   :  { %p286_p1 = pnand %p285_p0, %p279_p11 }
  0x20   :  { %289 = shalt.err (!%p286_p1)
}
  0x21   :  { %s298_s0 = smov 64   ;;  %s299_s17 = smov 4  }
  0x22   :  { %36 = dma.hbm_to_vmem [thread:$0]  %s423_s1, 256, %s31_s8, [#allocation6], %s298_s0, %s298_s0, %s299_s17  }
  0x23   :  { %290 = dma.done.wait [#allocation4], 256  }
  0x24   :  { %291 = vsyncadd [#allocation4], 4294967040 }
  0x25   :  { %292 = dma.done.wait [#allocation6], 256  }
  0x26   :  { %293 = vsyncadd [#allocation6], 4294967040  ;;  %v300_v0 = vmov 0.0   ;;  %vm301_vm0 = vmmov 0   ;;  %v244_v1 = vld [vmem:[#allocation5] sm:$0xff]   ;;  %v245_v2 = vld [vmem:[#allocation5 + $0x8] sm:$0xff]  }
  0x27   :  { %223 = vmatprep.subr.bf16.mxu0 %v300_v0  ;;  %227 = vmatprep.mubr.msk.bf16.mxu0 %vm301_vm0, %v300_v0  ;;  %v52_v3 = vld [vmem:[#allocation3] sm:$0xff]  ;;  %v53_v4 = vld [vmem:[#allocation3 + $0x8] sm:$0xff]  ;;  %vm71_vm1 = vcmask 261120   ;;  %vm133_vm2 = vcmask 125952   ;;  %s302_s21 = smov 96   ;;  %s303_s24 = smov 112  }
  0x28   :  { %224 = vmatpush3.bf16.msra.mxu0 %v244_v1  ;;  %v54_v5 = vpack.c.bf16 %v53_v4, %v52_v3  ;;  %s304_s25 = smov 80   ;;  %s305_s26 = smov 48  }
  0x29   :  { %225 = vmatprep.subr.bf16.mxu0 %v300_v0  ;;  %s306_s27 = smov 32  }
  0x2c   :  { %226 = vmatpush3.bf16.msra.mxu0 %v245_v2 }
  0x2f   :  { %228 = vmatmul.mubr.msk.bf16.vlgmr.msra.gmra.mrb[0].mxu0 %vm71_vm1, %v54_v5 }
 0x102   :  { %v109_v6 = vpop.f32.mrb[0].mxu0 }
 0x103   :  { %v218_v7 = vpack.c.bf16 %v109_v6, %v109_v6  ;;  %v229_v8 = vpop.f32.mrb[1].mxu0 }
 0x104   :  { %v112_v9 = vpop.f32.mrb[2].mxu0 }
 0x105   :  { %134 = vst.msk [vmem:[%s424_s2] sm:$0xf] %vm133_vm2, %v218_v7  ;;  %v219_v10 = vpack.c.bf16 %v112_v9, %v112_v9  ;;  %144 = vrot.lane.b32.xlu1 %v218_v7, %s298_s0  ;;  %136 = vrot.lane.b32.xlu0 %v218_v7, %s302_s21  ;;  %v230_v11 = vpop.f32.mrb[3].mxu0 }
 0x107   :  { %135 = vst.msk [vmem:[%s424_s2 + $0x4] sm:$0xf] %vm133_vm2, %v219_v10 }
 0x109   :  { %152 = vrot.lane.b32.xlu0 %v218_v7, %s303_s24  ;;  %146 = vrot.lane.b32.xlu1 %v219_v10, %s298_s0 }
 0x10d   :  { %161 = vrot.lane.b32.xlu0 %v218_v7, %s304_s25  ;;  %154 = vrot.lane.b32.xlu1 %v219_v10, %s303_s24 }
 0x111   :  { %170 = vrot.lane.b32.xlu0 %v218_v7, %s305_s26  ;;  %163 = vrot.lane.b32.xlu1 %v219_v10, %s304_s25 }
 0x115   :  { %172 = vrot.lane.b32.xlu1 %v219_v10, %s305_s26  ;;  %138 = vrot.lane.b32.xlu0 %v219_v10, %s302_s21 }
 0x119   :  { %183 = vrot.lane.b32.xlu1 %v112_v9, %s306_s27  ;;  %181 = vrot.lane.b32.xlu0 %v109_v6, %s306_s27 }
 0x177   :  { %v145_v12 = vpop.permute.xlu1 %144  ;;  %v137_v13 = vpop.permute.xlu0 %136 }
 0x178   :  { %150 = vst.msk [vmem:[%s426_s4] sm:$0xf] %vm133_vm2, %v145_v12  ;;  %142 = vst.msk [vmem:[%s425_s3] sm:$0xf] %vm133_vm2, %v137_v13 }
 0x17b   :  { %v153_v14 = vpop.permute.xlu0 %152  ;;  %v147_v15 = vpop.permute.xlu1 %146 }
 0x17c   :  { %212 = vst.msk [vmem:[%s424_s2 + $0x8] sm:$0xf] %vm133_vm2, %v153_v14  ;;  %151 = vst.msk [vmem:[%s426_s4 + $0x4] sm:$0xf] %vm133_vm2, %v147_v15 }
 0x17f   :  { %v162_v16 = vpop.permute.xlu0 %161  ;;  %v155_v17 = vpop.permute.xlu1 %154 }
 0x180   :  { %214 = vst.msk [vmem:[%s425_s3 + $0x8] sm:$0xf] %vm133_vm2, %v162_v16  ;;  %213 = vst.msk [vmem:[%s424_s2 + $0xc] sm:$0xf] %vm133_vm2, %v155_v17 }
 0x183   :  { %v171_v18 = vpop.permute.xlu0 %170  ;;  %v164_v19 = vpop.permute.xlu1 %163 }
 0x184   :  { %216 = vst.msk [vmem:[%s426_s4 + $0x8] sm:$0xf] %vm133_vm2, %v171_v18  ;;  %215 = vst.msk [vmem:[%s425_s3 + $0xc] sm:$0xf] %vm133_vm2, %v164_v19 }
 0x187   :  { %v173_v20 = vpop.permute.xlu1 %172  ;;  %v139_v21 = vpop.permute.xlu0 %138 }
 0x188   :  { %217 = vst.msk [vmem:[%s426_s4 + $0xc] sm:$0xf] %vm133_vm2, %v173_v20  ;;  %143 = vst.msk [vmem:[%s425_s3 + $0x4] sm:$0xf] %vm133_vm2, %v139_v21 }
 0x18b   :  { %v184_v22 = vpop.permute.xlu1 %183  ;;  %v182_v23 = vpop.permute.xlu0 %181 }
 0x18c   :  { %188 = vst.msk [vmem:[%s427_s5 + $0x8] sm:$0xff] %vm71_vm1, %v184_v22  ;;  %187 = vst.msk [vmem:[%s427_s5] sm:$0xff] %vm71_vm1, %v182_v23 }
 0x18d   :  { %205 = vsyncpa [#allocation4], 1 }
 0x18e   :  { %206 = vsyncpa [#allocation6], 1 }

// kernel: mablock_forward.7
= control target key start
LH: loop header
LB: loop body
LE: loop exit
PB: predicated region body
PF: predicated region fallthrough
CT: control target
= control target key end

     0   :  { %v288_v1 = vmov 0.0   ;;  %vm26_vm0 = vcmask 261120   ;;  %vm289_vm1 = vmmov 0   ;;  %s368_s0 = inlined_call_operand.vmem [shape: bf16[16,32], index: 0, kind: input, shape index: {}]   ;;  %s369_s1 = inlined_call_operand.vmem [shape: bf16[16,32], index: 1, kind: input, shape index: {}]   ;;  %s370_s2 = inlined_call_operand.vmem [shape: f32[16,32], index: 2, kind: input, shape index: {}]   ;;  %s371_s3 = inlined_call_operand.vmem [shape: bf16[32,32], index: 3, kind: input, shape index: {}]   ;;  %s372_s4 = inlined_call_operand.vmem [shape: f32[1,32], index: 4, kind: input, shape index: {}]   ;;  %s373_s5 = inlined_call_operand.hbm [shape: f32[16,32], index: 5, kind: output, shape index: {}]  }
   0x1   :  { %v252_v0 = vld [vmem:[%s371_s3] sm:$0xff]   ;;  %231 = vmatprep.subr.bf16.mxu0 %v288_v1  ;;  %239 = vmatprep.subr.bf16.mxu1 %v288_v1  ;;  %v253_v2 = vld [vmem:[%s371_s3 + $0x8] sm:$0xff]   ;;  %27 = vst.msk [vmem:[#allocation2] sm:$0xff] %vm26_vm0, %v288_v1  ;;  %28 = vst.msk [vmem:[#allocation2 + $0x8] sm:$0xff] %vm26_vm0, %v288_v1 }
   0x2   :  { %232 = vmatpush3.bf16.msra.mxu0 %v252_v0  ;;  %240 = vmatpush3.bf16.msra.mxu1 %v252_v0  ;;  %29 = vst.msk [vmem:[#allocation3] sm:$0xff] %vm26_vm0, %v288_v1  ;;  %30 = vst.msk [vmem:[#allocation3 + $0x8] sm:$0xff] %vm26_vm0, %v288_v1 }
   0x3   :  { %233 = vmatprep.subr.bf16.mxu0 %v288_v1  ;;  %241 = vmatprep.subr.bf16.mxu1 %v288_v1 }
   0x4   :  { %235 = vmatprep.mubr.msk.bf16.mxu0 %vm289_vm1, %v288_v1  ;;  %243 = vmatprep.mubr.msk.bf16.mxu1 %vm289_vm1, %v288_v1 }
   0x5   :  { %10 = vsyncpa [#allocation5], 0  ;;  %v254_v3 = vld [vmem:[%s368_s0] sm:$0xff]   ;;  %v166_v6 = vld [vmem:[%s370_s2 + $0x8] sm:$0xff] }
   0x6   :  { %v255_v4 = vld [vmem:[%s369_s1] sm:$0xff]   ;;  %234 = vmatpush3.bf16.msra.mxu0 %v253_v2  ;;  %242 = vmatpush3.bf16.msra.mxu1 %v253_v2  ;;  %v223_v8 = vmul.f32 -1.442695, %v166_v6 }
   0x7   :  { %v165_v5 = vld [vmem:[%s370_s2] sm:$0xff]  ;;  %s290_s2 = smov [#allocation4]  }
   0x8   :  { %v222_v7 = vmul.f32 -1.442695, %v165_v5  ;;  %v35_v12 = vld [vmem:[#allocation2] sm:$0xff]  ;;  %v36_v17 = vld [vmem:[#allocation2 + $0x8] sm:$0xff]  ;;  %s205_s29 = sshll.u32 %s290_s2, 4  ;;  %s206_s29 = int_to_ptr.vmem [resolvable:$true] %s205_s29 }
   0x9   :  { %236 = vmatmul.mubr.msk.bf16.vlgmr.msra.gmra.mrb[0].mxu0 %vm26_vm0, %v254_v3  ;;  %244 = vmatmul.mubr.msk.bf16.vlgmr.msra.gmra.mrb[0].mxu1 %vm26_vm0, %v255_v4  ;;  %v105_v13 = vld [vmem:[#allocation3] sm:$0xff]  ;;  %v106_v18 = vld [vmem:[#allocation3 + $0x8] sm:$0xff]  ;;  %v224_v31 = vld [vmem:[%s372_s4] ss:$0 sm:$0xff]  ;;  %s264_s4 = scalar_lea.vmem %s206_s29, 256  ;;  %p269_p1 = scmp.lt.s32.totalorder %s206_s29, %s206_s29 }
   0xa   :  { %256 = vpow2.f32 %v222_v7  ;;  %p265_p0 = scmp.ne.s32.totalorder %s206_s29, %s264_s4  ;;  %p270_p2 = scmp.lt.s32.totalorder %s264_s4, %s264_s4 }
   0xb   :  { %258 = vpow2.f32 %v223_v8 }
   0xc   :  { %p271_p3 = por %p270_p2, %p269_p1 }
   0xe   :  { %p272_p4 = pnand %p271_p3, %p265_p0 }
  0x14   :  { %v257_v9 = vpop.eup %256 }
  0x15   :  { %v259_v10 = vpop.eup %258  ;;  %v173_v11 = vadd.f32 1.0, %v257_v9 }
  0x16   :  { %v174_v14 = vadd.f32 1.0, %v259_v10 }
  0x17   :  { %260 = vrcp.f32 %v173_v11 }
  0x18   :  { %262 = vrcp.f32 %v174_v14 }
  0x21   :  { %v261_v29 = vpop.eup %260 }
  0x22   :  { %v263_v34 = vpop.eup %262 }
  0xdc   :  { %v94_v15 = vpop.f32.mrb[0].mxu0  ;;  %v151_v16 = vpop.f32.mrb[0].mxu1 }
  0xdd   :  { %v101_v19 = vadd.f32 %v94_v15, %v35_v12  ;;  %v158_v20 = vadd.f32 %v151_v16, %v105_v13  ;;  %v237_v21 = vpop.f32.mrb[1].mxu0  ;;  %v245_v22 = vpop.f32.mrb[1].mxu1 }
  0xde   :  { %v97_v23 = vpop.f32.mrb[2].mxu0  ;;  %v154_v24 = vpop.f32.mrb[2].mxu1 }
  0xdf   :  { %103 = vst.msk [vmem:[#allocation2] sm:$0xff] %vm26_vm0, %v101_v19  ;;  %160 = vst.msk [vmem:[#allocation3] sm:$0xff] %vm26_vm0, %v158_v20  ;;  %v102_v25 = vadd.f32 %v97_v23, %v36_v17  ;;  %v159_v26 = vadd.f32 %v154_v24, %v106_v18  ;;  %v238_v27 = vpop.f32.mrb[3].mxu0  ;;  %v246_v28 = vpop.f32.mrb[3].mxu1 }
  0xe1   :  { %104 = vst.msk [vmem:[#allocation2 + $0x8] sm:$0xff] %vm26_vm0, %v102_v25  ;;  %161 = vst.msk [vmem:[#allocation3 + $0x8] sm:$0xff] %vm26_vm0, %v159_v26 }
  0xe6   :  { %v179_v30 = vld [vmem:[#allocation3] sm:$0xff]  ;;  %v190_v32 = vld [vmem:[#allocation2] sm:$0xff] }
  0xe7   :  { %v192_v33 = vsub.f32 %v190_v32, %v179_v30  ;;  %v188_v37 = vadd.f32 %v224_v31, %v179_v30 }
  0xe8   :  { %v180_v35 = vld [vmem:[#allocation3 + $0x8] sm:$0xff]  ;;  %v191_v36 = vld [vmem:[#allocation2 + $0x8] sm:$0xff] }
  0xe9   :  { %v193_v38 = vsub.f32 %v191_v36, %v180_v35  ;;  %v194_v39 = vmul.f32 %v261_v29, %v192_v33  ;;  %v189_v40 = vadd.f32 %v224_v31, %v180_v35 }
  0xeb   :  { %v195_v41 = vmul.f32 %v263_v34, %v193_v38  ;;  %v196_v42 = vadd.f32 %v194_v39, %v188_v37 }
  0xed   :  { %v197_v43 = vadd.f32 %v195_v41, %v189_v40  ;;  %198 = vst.msk [vmem:[#allocation4] sm:$0xff] %vm26_vm0, %v196_v42 }
  0xef   :  { %199 = vst.msk [vmem:[#allocation4 + $0x8] sm:$0xff] %vm26_vm0, %v197_v43 }
  0xf0   :  { %275 = shalt.err (!%p272_p4)
}
  0xf1   :  { %s276_s7 = scalar_lea.hbm %s373_s5, 256 }
  0xf2   :  { %p277_p5 = scmp.ne.s32.totalorder %s373_s5, %s276_s7  ;;  %p280_p6 = scmp.lt.u32.totalorder %s276_s7, %s373_s5 }
  0xf4   :  { %p282_p7 = pnand %p280_p6, %p277_p5 }
  0xf6   :  { %285 = shalt.err (!%p282_p7)
}
  0xf7   :  { %s291_s12 = smov 128   ;;  %s292_s13 = smov 8  }
  0xf8   :  { %211 = dma.vmem_to_hbm [thread:$0]  %s206_s29, 256, %s373_s5, [#allocation5], %s291_s12, %s291_s12, %s292_s13  }
  0xf9   :  { %286 = dma.done.wait [#allocation5], 256  }
  0xfa   :  { %287 = vsyncadd [#allocation5], 4294967040 }
  0xfb   :  { %215 = vsyncpa [#allocation5], 1 }

// kernel: mablock_forward.6
= control target key start
LH: loop header
LB: loop body
LE: loop exit
PB: predicated region body
PF: predicated region fallthrough
CT: control target
= control target key end

     0   :  { %s1236_s12 = smov 0   ;;  %s1238_s13 = smov 0   ;;  %s1408_s0 = inlined_call_operand.vmem [shape: bf16[2,16,16], index: 0, kind: input, shape index: {}]   ;;  %s1409_s1 = inlined_call_operand.vmem [shape: bf16[2,16,16], index: 1, kind: input, shape index: {}]   ;;  %s1410_s2 = inlined_call_operand.vmem [shape: bf16[2,16,16], index: 2, kind: input, shape index: {}]   ;;  %s1411_s3 = inlined_call_operand.vmem [shape: bf16[16,32], index: 3, kind: output, shape index: {}]  }
   0x1   :  { %s1240_s14 = smov 0   ;;  %s1242_s15 = smov 0  }
   0x2   :  { %s1244_s16 = smov 0  }
   0x3 LB: > { %s25_s17 = sadd.s32 1, %s1205_s15  ;;  %p39_p1 = scmp.ne.s32.totalorder %s1197_s13, %s1193_s12  ;;  %s1209_s16 = sphi %s1244_s16, %s13_s16   ;;  %s1205_s15 = sphi %s1242_s15, %s1415_s15   ;;  %s1201_s14 = sphi %s1240_s14, %s1414_s14   ;;  %s1197_s13 = sphi %s1238_s13, %s1413_s13   ;;  %s1193_s12 = sphi %s1236_s12, %s1412_s12  }
   0x4   : > { %p27_p0 = scmp.ge.s32.totalorder %s25_s17, 2  ;;  %p40_p2 = scmp.eq.s32.totalorder %s1209_s16, 0 }
   0x5   : > { %s32_s19 = sadd.s32 1, %s1197_s13  ;;  %p1008_p5 = scmp.ge.s32.totalorder %s1209_s16, 2 }
   0x6   : > { %s1417_s17 = smov (%p27_p0, %s25_s17), 0  ;;  %p41_p3 = por %p40_p2, %p39_p1 }
   0x7   : > { %s29_s18 = ssub.s32 %s1205_s15, %s1417_s17  ;;  %161 = sbr.rel (%p1008_p5) target bundleno = 21 (0x15), region = 24 }
   0x8   : > { %p30_p4 = scmp.eq.s32.totalorder %s29_s18, 0 }
   0xa   : > { %s1271_s20 = scalar_select %p30_p4, %s1197_s13, %s32_s19  }
   0xe   : > { %164 = sbr.rel (!%p41_p3) target bundleno = 21 (0x15), region = 28  ;;  %s166_s21 = sand.u32 (%p41_p3), 1, %s1197_s13  }
   0xf   : > { %s1010_s22 = sshll.u32 (%p41_p3), %s1205_s15, 2  ;;  %s1009_s23 = sshll.u32 (%p41_p3), %s166_s21, 3 }
  0x10   : > { %s170_s26 = scalar_lea.vmem (%p41_p3), %s1408_s0, %s1010_s22  ;;  %s168_s27 = scalar_lea.vmem (%p41_p3), [#allocation5], %s1009_s23 }
  0x11   : > { %v186_v0 = vld [vmem:[%s170_s26] sm:$0xf] (%p41_p3)  ;;  %v188_v1 = vld [vmem:[%s170_s26 + $0x8] sm:$0xf] (%p41_p3) }
  0x12   : > { %187 = vst [vmem:[%s168_s27] sm:$0xf] (%p41_p3), %v186_v0  ;;  %189 = vst [vmem:[%s168_s27 + $0x4] sm:$0xf] (%p41_p3), %v188_v1 }
  0x15 PF: > { %p1011_p6 = scmp.ge.s32.totalorder %s1209_s16, 1  ;;  %p215_p7 = scmp.lt.s32.totalorder %s1209_s16, 3 }
  0x17   : > { %p216_p8 = pnand %p1011_p6, %p215_p7 }
  0x18   : > { %vm278_vm0 = vcmask (!%p216_p8), 130048   ;;  %v1211_v2 = vmov (!%p216_p8), 0.0   ;;  %v1159_v3 = vld [vmem:[%s1409_s1 + $0x8] sm:$0xff] (!%p216_p8)   ;;  %v1160_v4 = vld [vmem:[%s1409_s1] sm:$0xff] (!%p216_p8)   ;;  %vm1212_vm1 = vmmov (!%p216_p8), 0   ;;  %s222_s5 = sand.u32 (!%p216_p8), 1, %s1193_s12   ;;  %v396_v21 = vlaneseq (!%p216_p8) }
  0x19   : > { %219 = sbr.rel (%p216_p8) target bundleno = 1783 (0x6f7), region = 69  ;;  %1058 = vmatprep.subr.bf16.mxu1 (!%p216_p8), %v1211_v2  ;;  %279 = vst.msk [vmem:[#allocation3] sm:$0xff] (!%p216_p8), %vm278_vm0, %v1211_v2  ;;  %280 = vst.msk [vmem:[#allocation3 + $0x8] sm:$0xff] (!%p216_p8), %vm278_vm0, %v1211_v2  ;;  %1052 = vmatprep.subr.bf16.mxu0 (!%p216_p8), %v1211_v2  ;;  %v354_v5 = vsel (!%p216_p8), %vm278_vm0, %v1159_v3, 0  ;;  %s1012_s6 = sshll.u32 (!%p216_p8), %s222_s5, 3  ;;  %v303_v6 = vsel (!%p216_p8), %vm278_vm0, %v1160_v4, 0 }
  0x1a   : > { %281 = vst.msk [vmem:[#allocation4] sm:$0xff] (!%p216_p8), %vm278_vm0, %v1211_v2  ;;  %282 = vst.msk [vmem:[#allocation4 + $0x8] sm:$0xff] (!%p216_p8), %vm278_vm0, %v1211_v2  ;;  %1060 = vmatprep.mubr.msk.bf16.mxu1 (!%p216_p8), %vm1212_vm1, %v1211_v2  ;;  %1054 = vmatprep.mubr.msk.bf16.mxu0 (!%p216_p8), %vm1212_vm1, %v1211_v2  ;;  %s224_s7 = scalar_lea.vmem (!%p216_p8), [#allocation5], %s1012_s6  ;;  %vm275_vm2 = vcmask (!%p216_p8), 7168   ;;  %v1213_v9 = vmov (!%p216_p8), -inf   ;;  %v1214_v20 = vmov (!%p216_p8), 0  }
  0x1b   : > { %1059 = vmatpush3.bf16.xpose.msra.mxu1 (!%p216_p8), %v354_v5  ;;  %1053 = vmatpush3.bf16.xpose.msra.mxu0 (!%p216_p8), %v303_v6  ;;  %v1306_v7 = vld [vmem:[%s224_s7 + $0x4] sm:$0xf] (!%p216_p8)  ;;  %v1308_v8 = vld [vmem:[%s224_s7] sm:$0xf] (!%p216_p8)  ;;  %276 = vst.msk [vmem:[#allocation2] sm:$0xff] (!%p216_p8), %vm275_vm2, %v1213_v9  ;;  %277 = vst.msk [vmem:[#allocation2 + $0x8] sm:$0xff] (!%p216_p8), %vm275_vm2, %v1213_v9 }
  0x1c   : > { %1070 = vmatprep.subr.bf16.mxu1 (!%p216_p8), %v1211_v2  ;;  %1064 = vmatprep.subr.bf16.mxu0 (!%p216_p8), %v1211_v2  ;;  %v1324_v23 = vand.u32 (!%p216_p8), 127, %v396_v21  ;;  %v1161_v61 = vld [vmem:[%s1410_s2 + $0x8] sm:$0xff] (!%p216_p8)   ;;  %v1162_v1 = vld [vmem:[%s1410_s2] sm:$0xff] (!%p216_p8)   ;;  %s1215_s12 = smov (!%p216_p8), 16   ;;  %p266_p9 = scmp.lt.s32.totalorder (!%p216_p8), %s1201_s14, 1 }
  0x1d   : > { %1158 = vset.pattern.permute.xlu1 (!%p216_p8), %v1214_v20  ;;  %1157 = vset.pattern.permute.xlu0 (!%p216_p8), %v1214_v20 }
  0x20   : > { %v631_v6 = vld [vmem:[#allocation3 + $0x8] sm:$0xff]  ;;  %s1419_s14 = smov (!%p266_p9, %s1201_s14), 1 }
  0x21   : > { %s1013_s18 = sshll.u32 %s1419_s14, 2 }
  0x22   : > { %1061 = vmatmul.mubr.msk.bf16.vlgmr.msra.gmra.mrb[0].mxu1 %vm278_vm0, %v1306_v7  ;;  %1055 = vmatmul.mubr.msk.bf16.vlgmr.msra.gmra.mrb[0].mxu0 %vm278_vm0, %v1308_v8  ;;  %v627_v22 = vld [vmem:[#allocation2 + $0x8] sm:$0xff]  ;;  %v652_v26 = vld [vmem:[#allocation2] sm:$0xff]  ;;  %s269_s22 = scalar_lea.vmem %s1411_s3, %s1013_s18 }
  0x23   : > { %1071 = vmatpush3.bf16.msra.mxu1 %v1159_v3  ;;  %1072 = vmatprep.mubr.msk.bf16.mxu1 %vm1212_vm1, %v1211_v2 }
  0x24   : > { %1065 = vmatpush3.bf16.msra.mxu0 %v1160_v4  ;;  %1066 = vmatprep.mubr.msk.bf16.mxu0 %vm1212_vm1, %v1211_v2 }
  0x25   : > { %1082 = vmatprep.subr.bf16.mxu1 %v1211_v2  ;;  %1076 = vmatprep.subr.bf16.mxu0 %v1211_v2 }
  0xf5   : > { %v390_v10 = vpop.f32.mrb[0].mxu1  ;;  %v339_v13 = vpop.f32.mrb[0].mxu0 }
  0xf6   : > { %v1062_v11 = vpop.f32.mrb[1].mxu1  ;;  %v401_v12 = vsel %vm278_vm0, %v390_v10, -inf  ;;  %v1056_v15 = vpop.f32.mrb[1].mxu0  ;;  %v398_v17 = vsel %vm278_vm0, %v339_v13, -inf }
  0xf7   : > { %402 = vmax.xlane.f32.xlu0 %v401_v12  ;;  %v393_v14 = vpop.f32.mrb[2].mxu1  ;;  %v342_v18 = vpop.f32.mrb[2].mxu0 }
  0xf8   : > { %v1063_v16 = vpop.f32.mrb[3].mxu1  ;;  %v1057_v19 = vpop.f32.mrb[3].mxu0  ;;  %v630_v14 = vld [vmem:[#allocation3] sm:$0xff] }
  0xfb   : > { %399 = vmax.xlane.f32.xlu0 %v398_v17 }
 0x184   : > { %v403_v24 = vpop.xlane.xlu0 %402 }
 0x185   : > { %vm405_vm3 = vcmp.ge.f32.partialorder %v390_v10, %v403_v24  ;;  %v655_v25 = vmax.f32 %v627_v22, %v403_v24  ;;  %vm629_vm4 = vcmp.gt.f32.partialorder %v403_v24, %v627_v22 }
 0x186   : > { %v407_v27 = vsel %vm405_vm3, %v1324_v23, 16  ;;  %v633_v47 = vsel %vm629_vm4, 1, %v1214_v20  ;;  %vm804_vm3 = vcmask 1043456   ;;  %vm774_vm4 = vcmask 64512  }
 0x187   : > { %658 = vst.msk [vmem:[#allocation2 + $0x8] sm:$0xff] %vm275_vm2, %v655_v25  ;;  %v423_v28 = vsel %vm278_vm0, %v407_v27, 2147483647 }
 0x188   : > { %v400_v29 = vpop.xlane.xlu0 %399  ;;  %v425_v30 = vshra.s32 %v423_v28, 16  ;;  %v424_v37 = vand.u32 65535, %v423_v28  ;;  %v646_v28 = vld [vmem:[#allocation4] sm:$0xff] }
 0x189   : > { %vm404_vm5 = vcmp.ge.f32.partialorder %v339_v13, %v400_v29  ;;  %v654_v31 = vmax.f32 %v652_v26, %v400_v29  ;;  %vm628_vm9 = vcmp.gt.f32.partialorder %v400_v29, %v652_v26 }
 0x18a   : > { %v427_v32 = vcvt.s32.f32 %v425_v30  ;;  %v406_v33 = vsel %vm404_vm5, %v1324_v23, 16  ;;  %v426_v39 = vcvt.s32.f32 %v424_v37  ;;  %v632_v49 = vsel %vm628_vm9, 1, %v1214_v20 }
 0x18b   : > { %v408_v34 = vsel %vm278_vm0, %v406_v33, 2147483647  ;;  %657 = vst.msk [vmem:[#allocation2] sm:$0xff] %vm275_vm2, %v654_v31 }
 0x18c   : > { %428 = vmin.xlane.f32.xlu1 %v427_v32  ;;  %v410_v35 = vshra.s32 %v408_v34, 16  ;;  %v409_v40 = vand.u32 65535, %v408_v34 }
 0x18e   : > { %v412_v36 = vcvt.s32.f32 %v410_v35  ;;  %v411_v43 = vcvt.s32.f32 %v409_v40  ;;  %v667_v45 = vld [vmem:[#allocation2 + $0x8] sm:$0xff] }
 0x18f   : > { %vm669_vm8 = vcmp.gt.f32.partialorder %v667_v45, 0.0 }
 0x190   : > { %413 = vmin.xlane.f32.xlu1 %v412_v36  ;;  %v671_v46 = vsel %vm669_vm8, 1, %v1214_v20 }
 0x192   : > { %v666_v48 = vld [vmem:[#allocation2] sm:$0xff] }
 0x193   : > { %vm668_vm10 = vcmp.gt.f32.partialorder %v666_v48, 0.0 }
 0x194   : > { %v670_v50 = vsel %vm668_vm10, 1, %v1214_v20  ;;  %v647_v20 = vld [vmem:[#allocation4 + $0x8] sm:$0xff] }
 0x219   : > { %v429_v38 = vpop.xlane.xlu1 %428 }
 0x21a   : > { %vm430_vm6 = vcmp.eq.f32.partialorder %v427_v32, %v429_v38  ;;  %v435_v51 = vcvt.f32.s32 %v429_v38 }
 0x21b   : > { %v431_v41 = vsel %vm430_vm6, %v426_v39, inf }
 0x21c   : > { %432 = vmin.xlane.f32.xlu0 %v431_v41  ;;  %v436_v53 = vshll.u32 %v435_v51, 16 }
 0x21d   : > { %v414_v42 = vpop.xlane.xlu1 %413 }
 0x21e   : > { %vm415_vm7 = vcmp.eq.f32.partialorder %v412_v36, %v414_v42  ;;  %v420_v54 = vcvt.f32.s32 %v414_v42 }
 0x21f   : > { %v416_v44 = vsel %vm415_vm7, %v411_v43, inf }
 0x220   : > { %417 = vmin.xlane.f32.xlu1 %v416_v44  ;;  %v421_v58 = vshll.u32 %v420_v54, 16 }
 0x231   : > { %676 = vperm.xlu1 %1158, %v671_v46  }
 0x232   : > { %638 = vperm.xlu0 %1157, %v633_v47  }
 0x235   : > { %635 = vperm.xlu1 %1158, %v632_v49  }
 0x239   : > { %673 = vperm.xlu1 %1158, %v670_v50  }
 0x2a9   : > { %v433_v52 = vpop.xlane.xlu0 %432 }
 0x2aa   : > { %v434_v55 = vcvt.f32.s32 %v433_v52 }
 0x2ac   : > { %v437_v56 = vadd.s32 %v436_v53, %v434_v55 }
 0x2ad   : > { %v418_v57 = vpop.xlane.xlu1 %417 }
 0x2ae   : > { %vm439_vm11 = vcmp.eq.s32.totalorder %v1324_v23, %v437_v56  ;;  %v419_v59 = vcvt.f32.s32 %v418_v57 }
 0x2af   : > { %v1019_v60 = vsel %vm439_vm11, 1.0, %v1211_v2 }
 0x2b0   : > { %v445_v62 = vpack.c.bf16 %v1019_v60, %v1019_v60  ;;  %v422_v63 = vadd.s32 %v421_v58, %v419_v59 }
 0x2b1   : > { %v677_v4 = vpop.permute.xlu1 %676  ;;  %v639_v5 = vpop.permute.xlu0 %638 }
 0x2b2   : > { %vm438_vm12 = vcmp.eq.s32.totalorder %v1324_v23, %v422_v63  ;;  %1073 = vmatmul.mubr.msk.bf16.vlgmr.msra.gmra.mrb[4].mxu1 %vm278_vm0, %v445_v62  ;;  %vm641_vm13 = vcmp.eq.s32.totalorder %v639_v5, 1  ;;  %vm679_vm15 = vcmp.eq.s32.totalorder %v677_v4, 1 }
 0x2b3   : > { %v1018_v0 = vsel %vm438_vm12, 1.0, %v1211_v2  ;;  %1083 = vmatpush3.bf16.msra.mxu1 %v1161_v61  ;;  %1084 = vmatprep.mubr.msk.bf16.mxu1 %vm1212_vm1, %v1211_v2 }
 0x2b4   : > { %v444_v3 = vpack.c.bf16 %v1018_v0, %v1018_v0  ;;  %1094 = vmatprep.subr.bf16.mxu1 %v1211_v2 }
 0x2b5   : > { %v636_v10 = vpop.permute.xlu1 %635 }
 0x2b6   : > { %1067 = vmatmul.mubr.msk.bf16.vlgmr.msra.gmra.mrb[4].mxu0 %vm278_vm0, %v444_v3  ;;  %vm640_vm14 = vcmp.eq.s32.totalorder %v636_v10, 1 }
 0x2b7   : > { %1077 = vmatpush3.bf16.msra.mxu0 %v1162_v1  ;;  %1078 = vmatprep.mubr.msk.bf16.mxu0 %vm1212_vm1, %v1211_v2 }
 0x2b8   : > { %1088 = vmatprep.subr.bf16.mxu0 %v1211_v2 }
 0x2b9   : > { %v674_v26 = vpop.permute.xlu1 %673 }
 0x2ba   : > { %1085 = vmatmul.mubr.msk.bf16.vlgmr.msra.gmra.mrb[8].mxu1 %vm278_vm0, %v445_v62  ;;  %vm678_vm2 = vcmp.eq.s32.totalorder %v674_v26, 1 }
 0x2bb   : > { %1096 = vmatprep.mubr.msk.bf16.mxu1 %vm1212_vm1, %v1211_v2 }
 0x2be   : > { %1079 = vmatmul.mubr.msk.bf16.vlgmr.msra.gmra.mrb[8].mxu0 %vm278_vm0, %v444_v3 }
 0x2bf   : > { %1090 = vmatprep.mubr.msk.bf16.mxu0 %vm1212_vm1, %v1211_v2 }
 0x385   : > { %v528_v9 = vpop.f32.mrb[4].mxu1 }
 0x386   : > { %v643_v11 = vsel %vm641_vm13, %v528_v9, %v631_v6  ;;  %v1074_v12 = vpop.f32.mrb[5].mxu1 }
 0x387   : > { %645 = vst.msk [vmem:[#allocation3 + $0x8] sm:$0xff] %vm278_vm0, %v643_v11  ;;  %v531_v13 = vpop.f32.mrb[6].mxu1 }
 0x388   : > { %v1075_v15 = vpop.f32.mrb[7].mxu1 }
 0x389   : > { %v484_v16 = vpop.f32.mrb[4].mxu0 }
 0x38a   : > { %v642_v17 = vsel %vm640_vm14, %v484_v16, %v630_v14  ;;  %v1068_v18 = vpop.f32.mrb[5].mxu0 }
 0x38b   : > { %644 = vst.msk [vmem:[#allocation3] sm:$0xff] %vm278_vm0, %v642_v17  ;;  %v487_v19 = vpop.f32.mrb[6].mxu0 }
 0x38c   : > { %v1069_v21 = vpop.f32.mrb[7].mxu0 }
 0x38d   : > { %v620_v22 = vpop.f32.mrb[8].mxu1 }
 0x38e   : > { %v649_v23 = vsel %vm641_vm13, %v620_v22, %v647_v20  ;;  %v1086_v24 = vpop.f32.mrb[9].mxu1  ;;  %v663_v25 = vld [vmem:[#allocation3 + $0x8] sm:$0xff] }
 0x38f   : > { %651 = vst.msk [vmem:[#allocation4 + $0x8] sm:$0xff] %vm278_vm0, %v649_v23  ;;  %v623_v27 = vpop.f32.mrb[10].mxu1  ;;  %v681_v29 = vsel %vm679_vm15, %v663_v25, 0.0 }
 0x390   : > { %v1087_v30 = vpop.f32.mrb[11].mxu1  ;;  %v685_v31 = vpack.c.bf16 %v681_v29, %v681_v29 }
 0x391   : > { %v574_v32 = vpop.f32.mrb[8].mxu0 }
 0x392   : > { %v648_v33 = vsel %vm640_vm14, %v574_v32, %v646_v28  ;;  %v1080_v34 = vpop.f32.mrb[9].mxu0  ;;  %v730_v35 = vsel %vm278_vm0, %v685_v31, 0  ;;  %v662_v36 = vld [vmem:[#allocation3] sm:$0xff] }
 0x393   : > { %650 = vst.msk [vmem:[#allocation4] sm:$0xff] %vm278_vm0, %v648_v33  ;;  %v577_v37 = vpop.f32.mrb[10].mxu0  ;;  %1095 = vmatpush3.bf16.xpose.msra.mxu1 %v730_v35  ;;  %v680_v38 = vsel %vm678_vm2, %v662_v36, 0.0 }
 0x394   : > { %v1081_v39 = vpop.f32.mrb[11].mxu0  ;;  %v684_v40 = vpack.c.bf16 %v680_v38, %v680_v38  ;;  %1106 = vmatprep.subr.bf16.mxu1 %v1211_v2 }
 0x396   : > { %v687_v41 = vsel %vm278_vm0, %v684_v40, 0  ;;  %v665_v42 = vld [vmem:[#allocation4 + $0x8] sm:$0xff] }
 0x397   : > { %1089 = vmatpush3.bf16.xpose.msra.mxu0 %v687_v41  ;;  %v683_v43 = vsel %vm679_vm15, %v665_v42, 0.0 }
 0x398   : > { %v800_v44 = vpack.c.bf16 %v683_v43, %v683_v43  ;;  %1100 = vmatprep.subr.bf16.mxu0 %v1211_v2 }
 0x39a   : > { %1097 = vmatmul.mubr.msk.bf16.vlgmr.msra.gmra.mrb[12].mxu1 %vm278_vm0, %v1306_v7  ;;  %v852_v45 = vsel %vm804_vm3, %v800_v44, 0  ;;  %v664_v46 = vld [vmem:[#allocation4] sm:$0xff] }
 0x39b   : > { %1107 = vmatpush3.bf16.msra.mxu1 %v852_v45  ;;  %v682_v47 = vsel %vm678_vm2, %v664_v46, 0.0  ;;  %1108 = vmatprep.mubr.msk.bf16.mxu1 %vm1212_vm1, %v1211_v2 }
 0x39c   : > { %v799_v48 = vpack.c.bf16 %v682_v47, %v682_v47 }
 0x39e   : > { %1091 = vmatmul.mubr.msk.bf16.vlgmr.msra.gmra.mrb[12].mxu0 %vm278_vm0, %v1308_v8  ;;  %v806_v49 = vsel %vm804_vm3, %v799_v48, 0 }
 0x39f   : > { %1101 = vmatpush3.bf16.msra.mxu0 %v806_v49  ;;  %1102 = vmatprep.mubr.msk.bf16.mxu0 %vm1212_vm1, %v1211_v2  ;;  %vm903_vm1 = vcmask 257024  }
 0x46d   : > { %v766_v50 = vpop.f32.mrb[12].mxu1 }
 0x46e   : > { %v773_v7 = vmul.f32 0.25, %v766_v50  ;;  %v1098_v51 = vpop.f32.mrb[13].mxu1 }
 0x46f   : > { %v769_v52 = vpop.f32.mrb[14].mxu1 }
 0x470   : > { %v1099_v53 = vpop.f32.mrb[15].mxu1  ;;  %v778_v54 = vsel %vm774_vm4, %v773_v7, -inf }
 0x471   : > { %779 = vmax.xlane.f32.xlu1 %v778_v54  ;;  %v723_v55 = vpop.f32.mrb[12].mxu0 }
 0x472   : > { %v772_v56 = vmul.f32 0.25, %v723_v55  ;;  %v1092_v57 = vpop.f32.mrb[13].mxu0 }
 0x473   : > { %v726_v58 = vpop.f32.mrb[14].mxu0 }
 0x474   : > { %v775_v8 = vsel %vm774_vm4, %v772_v56, -inf  ;;  %v1093_v59 = vpop.f32.mrb[15].mxu0 }
 0x475   : > { %776 = vmax.xlane.f32.xlu0 %v775_v8 }
 0x4fe   : > { %v780_v60 = vpop.xlane.xlu1 %779 }
 0x4ff   : > { %v782_v61 = vsub.f32 %v773_v7, %v780_v60 }
 0x501   : > { %v785_v2 = vmul.f32 1.442695, %v782_v61 }
 0x502   : > { %v777_v62 = vpop.xlane.xlu0 %776 }
 0x503   : > { %1163 = vpow2.f32 %v785_v2  ;;  %v781_v63 = vsub.f32 %v772_v56, %v777_v62 }
 0x505   : > { %v783_v0 = vmul.f32 1.442695, %v781_v63 }
 0x507   : > { %1165 = vpow2.f32 %v783_v0 }
 0x50d   : > { %v1164_v1 = vpop.eup %1163 }
 0x50e   : > { %v790_v3 = vsel %vm774_vm4, %v1164_v1, 0.0 }
 0x50f   : > { %791 = vadd.xlane.f32.xlu1 %v790_v3 }
 0x511   : > { %v1166_v4 = vpop.eup %1165 }
 0x512   : > { %v787_v5 = vsel %vm774_vm4, %v1166_v4, 0.0 }
 0x513   : > { %788 = vadd.xlane.f32.xlu1 %v787_v5 }
 0x59c   : > { %v792_v6 = vpop.xlane.xlu1 %791 }
 0x59d   : > { %1167 = vrcp.f32 %v792_v6 }
 0x5a0   : > { %v789_v9 = vpop.xlane.xlu1 %788 }
 0x5a1   : > { %1169 = vrcp.f32 %v789_v9 }
 0x5a7   : > { %v1168_v10 = vpop.eup %1167 }
 0x5a8   : > { %v796_v11 = vmul.f32 %v1168_v10, %v1164_v1 }
 0x5aa   : > { %v798_v12 = vpack.c.bf16 %v796_v11, %v796_v11 }
 0x5ab   : > { %v1170_v13 = vpop.eup %1169 }
 0x5ac   : > { %v795_v14 = vmul.f32 %v1170_v13, %v1166_v4  ;;  %1109 = vmatmul.mubr.msk.bf16.vlgmr.msra.gmra.mrb[16].mxu1 %vm774_vm4, %v798_v12 }
 0x5ae   : > { %v797_v15 = vpack.c.bf16 %v795_v14, %v795_v14 }
 0x5b0   : > { %1103 = vmatmul.mubr.msk.bf16.vlgmr.msra.gmra.mrb[16].mxu0 %vm774_vm4, %v797_v15 }
 0x67f   : > { %v888_v16 = vpop.f32.mrb[16].mxu1 }
 0x680   : > { %v895_v17 = vpack.c.bf16 %v888_v16, %v888_v16  ;;  %v1110_v18 = vpop.f32.mrb[17].mxu1 }
 0x681   : > { %v891_v19 = vpop.f32.mrb[18].mxu1 }
 0x682   : > { %v1111_v20 = vpop.f32.mrb[19].mxu1  ;;  %897 = vrot.lane.b32.xlu1 %v895_v17, %s1215_s12 }
 0x683   : > { %v842_v21 = vpop.f32.mrb[16].mxu0 }
 0x684   : > { %v1104_v22 = vpop.f32.mrb[17].mxu0  ;;  %v894_v25 = vpack.c.bf16 %v842_v21, %v842_v21 }
 0x685   : > { %v845_v23 = vpop.f32.mrb[18].mxu0 }
 0x686   : > { %v1105_v24 = vpop.f32.mrb[19].mxu0 }
 0x6f4   : > { %v898_v26 = vpop.permute.xlu1 %897 }
 0x6f5   : > { %v901_v27 = vsel %vm278_vm0, %v894_v25, %v898_v26 }
 0x6f6   : > { %904 = vst.msk [vmem:[%s269_s22] sm:$0xf] %vm903_vm1, %v901_v27 }
 0x6f7 PF: > { %s13_s16 = sadd.s32 1, %s1209_s16   ;;  %s1412_s12 = smov %s1197_s13 }
 0x6f8   : > { %p10_p10 = scmp.ge.s32.totalorder %s13_s16, 4   ;;  %s1413_s13 = smov %s1271_s20 }
 0x6f9   : > { %s1414_s14 = smov %s1205_s15  ;;  %s1415_s15 = smov %s1417_s17 }
 0x6fa   :  { %12 = sbr.rel (!%p10_p10) target bundleno = 3 (0x3), region = 122 }

</bundles_post_ra>
